<compile_context>
chip_gen: v7x
topology: tpu7x:2x2x1
jax: 0.10.0
libtpu: 0.0.40
codegen_flags: <defaults>
</compile_context>

<pallas_src>
import functools

import jax
import jax.numpy as jnp
from jax.experimental import pallas as pl
from jax.experimental.pallas import tpu as pltpu

EPS = 1e-10

# ---- small, deterministic problem sizes -------------------------------------
B = 2       # batch
N = 128     # points
C = 128     # global invariant feature dim (inv_f)
CP = 64     # per-point invariant feature dim (inv_f_p)
S = 8       # segmentation classes
T, DT = 8, 32     # retrieval tokens: T tokens of dim DT
DF = 64     # retrieval per-point feature dim
K = 16      # keypoints

# Column layout of the concatenated per-point head matrix (lane offsets).
WIDE = 128                      # padded lane width of the fused head matmul
OFF_DF = 0                      # retrieval feature columns   [0, 64)
OFF_S = DF                      # seg logit columns           [64, 72)
OFF_K = DF + S                  # keypoint score columns      [72, 88)
OFF_C3 = DF + S + K             # coordinate columns          [88, 91)


# =============================================================================
# Fused per-branch kernel
# =============================================================================

def _fused_branch_kernel(*refs, with_cage):
    """One grid step == one batch element of one branch (full or partial).

    Computes: inv_f L2-normalization, Seg_net stand-in, RetrievalNetV2
    stand-in (incl. pooled retrieval_feature + tokens), KeypointExactionV2
    stand-in, keypoint rescale by ||inv_f||, and (optionally) the CageSkinning
    stand-in against the full-branch keypoints.
    """
    if with_cage:
        (invf_ref, fp_ref, ww_ref, wg_ref, brow_ref, w2_ref, wt_ref, bt_ref,
         fkp_ref, wblend_ref,
         inv_o, seg_o, feat_o, tok_o, kp_o, cage_o, def_o) = refs
    else:
        (invf_ref, fp_ref, ww_ref, wg_ref, brow_ref, w2_ref, wt_ref, bt_ref,
         inv_o, seg_o, feat_o, tok_o, kp_o) = refs

    # ---- L2 normalize global invariant feature ------------------------------
    x = invf_ref[0].astype(jnp.float32)                       # [1, C]
    nrm = jnp.sqrt(jnp.sum(x * x, axis=-1, keepdims=True))
    g = x / (nrm + EPS)                                       # [1, C]
    inv_o[0] = g.astype(inv_o.dtype)
    # torch.norm of the *already normalized* inv_f (scales keypoints, ~1.0)
    g_norm = jnp.sqrt(jnp.sum(g * g, axis=-1, keepdims=True))  # [1, 1]

    # ---- one wide, lane-dense per-point matmul over all heads ---------------
    fp = fp_ref[0]                                             # [N, CP]
    wide = jnp.dot(fp.astype(jnp.bfloat16), ww_ref[...],
                   preferred_element_type=jnp.float32)         # [N, WIDE]
    # global-feature contribution (g@wg | g@wgk packed into one matrix) + bias
    wide = wide + jnp.dot(g, wg_ref[...], preferred_element_type=jnp.float32)
    wide = wide + brow_ref[...]

    feat_pre = wide[:, OFF_DF:OFF_DF + DF]                     # [N, DF]
    seg_logits = wide[:, OFF_S:OFF_S + S]                      # [N, S]
    kp_scores = wide[:, OFF_K:OFF_K + K]                       # [N, K]
    coords = wide[:, OFF_C3:OFF_C3 + 3]                        # [N, 3]

    # ---- Seg_net stand-in: per-point softmax over classes -------------------
    m = jnp.max(seg_logits, axis=-1, keepdims=True)
    e = jnp.exp(seg_logits - m)
    seg = e / jnp.sum(e, axis=-1, keepdims=True)               # [N, S]
    seg_o[0] = seg.astype(seg_o.dtype)

    # ---- RetrievalNetV2 stand-in --------------------------------------------
    feat = jnp.maximum(
        feat_pre + jnp.dot(seg, w2_ref[...], preferred_element_type=jnp.float32),
        0.0)                                                   # [N, DF]
    pooled = jnp.mean(feat, axis=0, keepdims=True)             # [1, DF]  == feature.mean(1)
    feat_o[0] = pooled.astype(feat_o.dtype)
    tok = jnp.dot(pooled, wt_ref[...], preferred_element_type=jnp.float32) + bt_ref[...]
    tok_o[0] = tok.astype(tok_o.dtype)                         # [1, T*DT]

    # ---- KeypointExactionV2 stand-in: attention pooling over points ---------
    mk = jnp.max(kp_scores, axis=0, keepdims=True)
    ek = jnp.exp(kp_scores - mk)
    attn = ek / (jnp.sum(ek, axis=0, keepdims=True) + EPS)     # [N, K]
    kp = jax.lax.dot_general(attn, coords, (((0,), (0,)), ((), ())),
                             preferred_element_type=jnp.float32)  # [K, 3]
    kp = kp * g_norm                                           # keypoints * ||inv_f||
    kp_o[0] = kp.astype(kp_o.dtype)

    # ---- CageSkinning stand-in (partial branch only) -------------------------
    if with_cage:
        # TODO(synk): CageSkinning definition unavailable; stand-in deformation.
        fkp = fkp_ref[0].astype(jnp.float32)                   # [K, 3] full keypoints
        off = jnp.dot(wblend_ref[...], kp - fkp, preferred_element_type=jnp.float32)
        cage_o[0] = fkp.astype(cage_o.dtype)
        def_o[0] = (fkp + off).astype(def_o.dtype)


def fused_branch(branch_params, inv_f, inv_f_p, f_keypoints=None, cage_params=None):
    """Run one branch (full or partial) as a single pallas_call over grid=(B,)."""
    with_cage = f_keypoints is not None
    inv_f3 = inv_f[:, None, :]                                 # [B, 1, C]

    in_specs = [
        pl.BlockSpec((1, 1, C), lambda b: (b, 0, 0)),          # inv_f
        pl.BlockSpec((1, N, CP), lambda b: (b, 0, 0)),         # inv_f_p
        pl.BlockSpec((CP, WIDE), lambda b: (0, 0)),            # concatenated head weights (bf16)
        pl.BlockSpec((C, WIDE), lambda b: (0, 0)),             # concatenated global weights
        pl.BlockSpec((1, WIDE), lambda b: (0, 0)),             # concatenated bias row
        pl.BlockSpec((S, DF), lambda b: (0, 0)),               # w2
        pl.BlockSpec((DF, T * DT), lambda b: (0, 0)),          # wt
        pl.BlockSpec((1, T * DT), lambda b: (0, 0)),           # bt
    ]
    inputs = [inv_f3, inv_f_p,
              branch_params["w_wide"], branch_params["wg_wide"],
              branch_params["bias_row"], branch_params["w2"],
              branch_params["wt"], branch_params["bt"]]

    out_shape = [
        jax.ShapeDtypeStruct((B, 1, C), jnp.float32),          # normalized inv_f
        jax.ShapeDtypeStruct((B, N, S), jnp.float32),          # pc_seg
        jax.ShapeDtypeStruct((B, 1, DF), jnp.float32),         # retrieval_feature
        jax.ShapeDtypeStruct((B, 1, T * DT), jnp.float32),     # retrieval tokens (flat)
        jax.ShapeDtypeStruct((B, K, 3), jnp.float32),          # scaled keypoints
    ]
    out_specs = [
        pl.BlockSpec((1, 1, C), lambda b: (b, 0, 0)),
        pl.BlockSpec((1, N, S), lambda b: (b, 0, 0)),
        pl.BlockSpec((1, 1, DF), lambda b: (b, 0, 0)),
        pl.BlockSpec((1, 1, T * DT), lambda b: (b, 0, 0)),
        pl.BlockSpec((1, K, 3), lambda b: (b, 0, 0)),
    ]

    if with_cage:
        in_specs += [pl.BlockSpec((1, K, 3), lambda b: (b, 0, 0)),   # full-branch keypoints
                     pl.BlockSpec((K, K), lambda b: (0, 0))]         # cage blend weights
        inputs += [f_keypoints, cage_params["wblend"]]
        out_shape += [jax.ShapeDtypeStruct((B, K, 3), jnp.float32),  # cage
                      jax.ShapeDtypeStruct((B, K, 3), jnp.float32)]  # deformed keypoints
        out_specs += [pl.BlockSpec((1, K, 3), lambda b: (b, 0, 0)),
                      pl.BlockSpec((1, K, 3), lambda b: (b, 0, 0))]

    outs = pl.pallas_call(
        functools.partial(_fused_branch_kernel, with_cage=with_cage),
        out_shape=tuple(out_shape),
        grid=(B,),
        in_specs=in_specs,
        out_specs=tuple(out_specs),
        compiler_params=pltpu.CompilerParams(dimension_semantics=("parallel",)),
    )(*inputs)

    inv_n, seg, feat, tok, kp = outs[:5]
    result = {
        "inv_f": inv_n[:, 0, :],
        "pc_seg": seg,
        "retrieval_feature": feat[:, 0, :],
        "retrieval_tokens": tok.reshape(B, T, DT),
        "keypoints": kp,
    }
    if with_cage:
        result["cage"] = outs[5]
        result["deformed_keypoints"] = outs[6]
    return result


# =============================================================================
# Parameters (deterministic, in-script)
# =============================================================================

def init_params():
    key = jax.random.PRNGKey(42)
    ks = iter(jax.random.split(key, 32))

    def w(shape, scale=0.1):
        return (scale * jax.random.normal(next(ks), shape)).astype(jnp.float32)

    def branch_params():
        # raw stand-in weights for the three sub-nets of one branch
        wp = w((CP, S))            # seg head
        wg = w((C, S))             # seg global head
        b_seg = jnp.zeros((1, S), jnp.float32)
        w1 = w((CP, DF))           # retrieval per-point head
        w2 = w((S, DF))
        b_ret = jnp.zeros((1, DF), jnp.float32)
        wt = w((DF, T * DT))
        bt = jnp.zeros((1, T * DT), jnp.float32)
        wk = w((CP, K))            # keypoint score head
        wgk = w((C, K))            # keypoint global head
        wc = w((CP, 3))            # keypoint coord head

        # concatenate the per-point heads into one lane-dense [CP, 128] matrix
        w_wide = jnp.zeros((CP, WIDE), jnp.float32)
        w_wide = w_wide.at[:, OFF_DF:OFF_DF + DF].set(w1)
        w_wide = w_wide.at[:, OFF_S:OFF_S + S].set(wp)
        w_wide = w_wide.at[:, OFF_K:OFF_K + K].set(wk)
        w_wide = w_wide.at[:, OFF_C3:OFF_C3 + 3].set(wc)

        # concatenate the global-feature heads (same column layout)
        wg_wide = jnp.zeros((C, WIDE), jnp.float32)
        wg_wide = wg_wide.at[:, OFF_S:OFF_S + S].set(wg)
        wg_wide = wg_wide.at[:, OFF_K:OFF_K + K].set(wgk)

        # concatenate the biases into one broadcast row
        bias_row = jnp.zeros((1, WIDE), jnp.float32)
        bias_row = bias_row.at[:, OFF_S:OFF_S + S].set(b_seg)
        bias_row = bias_row.at[:, OFF_DF:OFF_DF + DF].set(b_ret)

        return {
            "w_wide": w_wide.astype(jnp.bfloat16),   # bf16 MXU inputs (f32 accum)
            "wg_wide": wg_wide,
            "bias_row": bias_row,
            "w2": w2,
            "wt": wt,
            "bt": bt,
        }

    return {
        "full": branch_params(),
        "part": branch_params(),
        "cage": {"wblend": w((K, K))},
    }


# =============================================================================
# Module forward (mirrors I_RED_rd_cage.forward)
# =============================================================================

def i_red_rd_cage_forward(params, pred_f_RandD, pred_p_RandD=None, use_partial=True):
    # Full branch: one fused pallas_call (normalize + seg + retrieval + keypoints).
    f_out = fused_branch(params["full"], pred_f_RandD["inv_f"], pred_f_RandD["inv_f_p"])

    cage_out = None
    p_out = None
    if pred_p_RandD is not None:
        tag = "part" if use_partial else "full"
        # Partial branch: second fused pallas_call; cage deformation folded into its tail.
        p_out = fused_branch(params[tag], pred_p_RandD["inv_f"], pred_p_RandD["inv_f_p"],
                             f_keypoints=f_out["keypoints"], cage_params=params["cage"])
        cage_out = {"cage": p_out["cage"],
                    "deformed_keypoints": p_out["deformed_keypoints"]}

    pred_rd_full = {
        "inv_f": f_out["inv_f"],
        "inv_f_p": pred_f_RandD["inv_f_p"],
        "recon_pc": jnp.transpose(pred_f_RandD["recon_pc"], (0, 2, 1)),
        "pc_seg": f_out["pc_seg"],
        "retrieval_tokens": f_out["retrieval_tokens"],
        "retrieval_feature": f_out["retrieval_feature"],
        "keypoints": f_out["keypoints"],
        "rot": pred_f_RandD["rot"],
        "t": pred_f_RandD["t"],
    }

    if pred_p_RandD is not None:
        pred_rd_partial = {
            "inv_f": p_out["inv_f"],
            "inv_f_p": pred_p_RandD["inv_f_p"],
            "recon_pc": jnp.transpose(pred_p_RandD["recon_pc"], (0, 2, 1)),
            "pc_seg": p_out["pc_seg"],
            "retrieval_tokens": p_out["retrieval_tokens"],
            "retrieval_feature": p_out["retrieval_feature"],
            "keypoints": p_out["keypoints"],
            "rot": pred_p_RandD["rot"],
            "t": pred_p_RandD["t"],
        }
        if "full_pc_at_inv" in pred_p_RandD:
            pred_rd_partial["full_pc_at_inv"] = jnp.transpose(
                pred_p_RandD["full_pc_at_inv"], (0, 2, 1))
        return pred_rd_full, pred_rd_partial, cage_out
    return pred_rd_full, cage_out


# =============================================================================
# Main
# =============================================================================

if __name__ == "__main__":
    params = init_params()

    key = jax.random.PRNGKey(0)
    kf = jax.random.split(key, 12)

    pred_f = {
        "inv_f": jax.random.normal(kf[0], (B, C), jnp.float32),
        "inv_f_p": jax.random.normal(kf[1], (B, N, CP), jnp.float32),
        "recon_pc": jax.random.normal(kf[2], (B, 3, N), jnp.float32),
        "rot": jax.random.normal(kf[3], (B, 3, 3), jnp.float32),
        "t": jax.random.normal(kf[4], (B, 3), jnp.float32),
    }
    pred_p = {
        "inv_f": jax.random.normal(kf[5], (B, C), jnp.float32),
        "inv_f_p": jax.random.normal(kf[6], (B, N, CP), jnp.float32),
        "recon_pc": jax.random.normal(kf[7], (B, 3, N), jnp.float32),
        "rot": jax.random.normal(kf[8], (B, 3, 3), jnp.float32),
        "t": jax.random.normal(kf[9], (B, 3), jnp.float32),
        "full_pc_at_inv": jax.random.normal(kf[10], (B, 3, N), jnp.float32),
    }

    out_full, out_partial, cage_out = i_red_rd_cage_forward(params, pred_f, pred_p)
    jax.block_until_ready((out_full, out_partial, cage_out))

    # light sanity checks
    assert out_full["inv_f"].shape == (B, C)
    assert out_full["pc_seg"].shape == (B, N, S)
    assert out_full["retrieval_tokens"].shape == (B, T, DT)
    assert out_full["retrieval_feature"].shape == (B, DF)
    assert out_full["keypoints"].shape == (B, K, 3)
    assert out_full["recon_pc"].shape == (B, N, 3)
    assert out_partial["pc_seg"].shape == (B, N, S)
    assert out_partial["full_pc_at_inv"].shape == (B, N, 3)
    assert cage_out["cage"].shape == (B, K, 3)
    assert cage_out["deformed_keypoints"].shape == (B, K, 3)

    print("KERNEL_OK")
</pallas_src>

<mosaic_0001>
module attributes {stable_mosaic.version = 11 : i64} {
  func.func @_fused_branch_kernel(%arg0: i32, %arg1: memref<1x1x128xf32, #tpu.memory_space<vmem>>, %arg2: memref<1x128x64xf32, #tpu.memory_space<vmem>>, %arg3: memref<64x128xbf16, #tpu.memory_space<vmem>>, %arg4: memref<128x128xf32, #tpu.memory_space<vmem>>, %arg5: memref<1x128xf32, #tpu.memory_space<vmem>>, %arg6: memref<8x64xf32, #tpu.memory_space<vmem>>, %arg7: memref<64x256xf32, #tpu.memory_space<vmem>>, %arg8: memref<1x256xf32, #tpu.memory_space<vmem>>, %arg9: memref<1x1x128xf32, #tpu.memory_space<vmem>>, %arg10: memref<1x128x8xf32, #tpu.memory_space<vmem>>, %arg11: memref<1x1x64xf32, #tpu.memory_space<vmem>>, %arg12: memref<1x1x256xf32, #tpu.memory_space<vmem>>, %arg13: memref<1x16x3xf32, #tpu.memory_space<vmem>>) attributes {dimension_semantics = [#tpu.dimension_semantics<parallel>], iteration_bounds = array<i64: 2>, scalar_prefetch = 0 : i64, scratch_operands = 0 : i64, tpu.core_type = #tpu.core_type<tc>, window_params = [{transform_indices = @transform_0, window_bounds = array<i64: 1, 1, 128>}, {transform_indices = @transform_1, window_bounds = array<i64: 1, 128, 64>}, {pipeline_mode = #tpu.pipeline_mode<synchronous>, transform_indices = @transform_2, window_bounds = array<i64: 64, 128>}, {pipeline_mode = #tpu.pipeline_mode<synchronous>, transform_indices = @transform_3, window_bounds = array<i64: 128, 128>}, {pipeline_mode = #tpu.pipeline_mode<synchronous>, transform_indices = @transform_4, window_bounds = array<i64: 1, 128>}, {pipeline_mode = #tpu.pipeline_mode<synchronous>, transform_indices = @transform_5, window_bounds = array<i64: 8, 64>}, {pipeline_mode = #tpu.pipeline_mode<synchronous>, transform_indices = @transform_6, window_bounds = array<i64: 64, 256>}, {pipeline_mode = #tpu.pipeline_mode<synchronous>, transform_indices = @transform_7, window_bounds = array<i64: 1, 256>}, {transform_indices = @transform_8, window_bounds = array<i64: 1, 1, 128>}, {transform_indices = @transform_9, window_bounds = array<i64: 1, 128, 8>}, {transform_indices = @transform_10, window_bounds = array<i64: 1, 1, 64>}, {transform_indices = @transform_11, window_bounds = array<i64: 1, 1, 256>}, {transform_indices = @transform_12, window_bounds = array<i64: 1, 16, 3>}]} {
    %c0 = arith.constant 0 : index
    %c0_0 = arith.constant 0 : index
    %c0_1 = arith.constant 0 : index
    %0 = vector.load %arg1[%c0, %c0_0, %c0_1] : memref<1x1x128xf32, #tpu.memory_space<vmem>>, vector<1x1x128xf32>
    %1 = vector.shape_cast %0 : vector<1x1x128xf32> to vector<1x128xf32>
    %2 = arith.mulf %1, %1 : vector<1x128xf32>
    %cst = arith.constant dense<0.000000e+00> : vector<1xf32>
    %3 = vector.multi_reduction <add>, %2, %cst [1] : vector<1x128xf32> to vector<1xf32>
    %4 = vector.shape_cast %3 : vector<1xf32> to vector<1x1xf32>
    %5 = math.sqrt %4 : vector<1x1xf32>
    %cst_2 = arith.constant 1.000000e-10 : f32
    %6 = vector.broadcast %cst_2 : f32 to vector<1x1xf32>
    %7 = arith.addf %5, %6 : vector<1x1xf32>
    %8 = vector.broadcast %7 : vector<1x1xf32> to vector<1x128xf32>
    %9 = arith.divf %1, %8 : vector<1x128xf32>
    %c0_3 = arith.constant 0 : index
    %c0_4 = arith.constant 0 : index
    %c0_5 = arith.constant 0 : index
    %10 = vector.load %arg9[%c0_3, %c0_4, %c0_5] : memref<1x1x128xf32, #tpu.memory_space<vmem>>, vector<1x1x128xf32>
    %11 = vector.shape_cast %10 : vector<1x1x128xf32> to vector<1x128xf32>
    %12 = vector.shape_cast %9 : vector<1x128xf32> to vector<1x1x128xf32>
    tpu.vector_store %arg9[%c0_3, %c0_4, %c0_5], %12 {strides = array<i32>} : memref<1x1x128xf32, #tpu.memory_space<vmem>>, vector<1x1x128xf32>,
    %13 = arith.mulf %9, %9 : vector<1x128xf32>
    %cst_6 = arith.constant dense<0.000000e+00> : vector<1xf32>
    %14 = vector.multi_reduction <add>, %13, %cst_6 [1] : vector<1x128xf32> to vector<1xf32>
    %15 = vector.shape_cast %14 : vector<1xf32> to vector<1x1xf32>
    %16 = math.sqrt %15 : vector<1x1xf32>
    %c0_7 = arith.constant 0 : index
    %c0_8 = arith.constant 0 : index
    %c0_9 = arith.constant 0 : index
    %17 = vector.load %arg2[%c0_7, %c0_8, %c0_9] : memref<1x128x64xf32, #tpu.memory_space<vmem>>, vector<1x128x64xf32>
    %18 = vector.shape_cast %17 : vector<1x128x64xf32> to vector<128x64xf32>
    %19 = arith.truncf %18 : vector<128x64xf32> to vector<128x64xbf16>
    %c0_10 = arith.constant 0 : index
    %c0_11 = arith.constant 0 : index
    %20 = vector.load %arg3[%c0_10, %c0_11] : memref<64x128xbf16, #tpu.memory_space<vmem>>, vector<64x128xbf16>
    %cst_12 = arith.constant dense<0.000000e+00> : vector<128x128xf32>
    %21 = tpu.matmul %19, %20, %cst_12 {dimension_numbers = #tpu.dot_dimension_numbers<[1], [0], [0], [1], [0, 0, 1, 1], [], []>} : vector<128x64xbf16>, vector<64x128xbf16>, vector<128x128xf32> -> vector<128x128xf32>
    %c0_13 = arith.constant 0 : index
    %c0_14 = arith.constant 0 : index
    %22 = vector.load %arg4[%c0_13, %c0_14] : memref<128x128xf32, #tpu.memory_space<vmem>>, vector<128x128xf32>
    %cst_15 = arith.constant dense<0.000000e+00> : vector<1x128xf32>
    %23 = tpu.matmul %9, %22, %cst_15 {dimension_numbers = #tpu.dot_dimension_numbers<[1], [0], [0], [1], [0, 0, 1, 1], [], []>} : vector<1x128xf32>, vector<128x128xf32>, vector<1x128xf32> -> vector<1x128xf32>
    %24 = vector.broadcast %23 : vector<1x128xf32> to vector<128x128xf32>
    %25 = arith.addf %21, %24 : vector<128x128xf32>
    %c0_16 = arith.constant 0 : index
    %c0_17 = arith.constant 0 : index
    %26 = vector.load %arg5[%c0_16, %c0_17] : memref<1x128xf32, #tpu.memory_space<vmem>>, vector<1x128xf32>
    %27 = vector.broadcast %26 : vector<1x128xf32> to vector<128x128xf32>
    %28 = arith.addf %25, %27 : vector<128x128xf32>
    %29 = vector.extract_strided_slice %28 {offsets = [0, 0], sizes = [128, 64], strides = [1, 1]} : vector<128x128xf32> to vector<128x64xf32>
    %30 = vector.extract_strided_slice %28 {offsets = [0, 64], sizes = [128, 8], strides = [1, 1]} : vector<128x128xf32> to vector<128x8xf32>
    %31 = vector.extract_strided_slice %28 {offsets = [0, 72], sizes = [128, 16], strides = [1, 1]} : vector<128x128xf32> to vector<128x16xf32>
    %32 = vector.extract_strided_slice %28 {offsets = [0, 88], sizes = [128, 3], strides = [1, 1]} : vector<128x128xf32> to vector<128x3xf32>
    %cst_18 = arith.constant dense<0xFF800000> : vector<128xf32>
    %33 = vector.multi_reduction <maximumf>, %30, %cst_18 [1] : vector<128x8xf32> to vector<128xf32>
    %34 = vector.shape_cast %33 : vector<128xf32> to vector<128x1xf32>
    %35 = vector.broadcast %34 : vector<128x1xf32> to vector<128x8xf32>
    %36 = arith.subf %30, %35 : vector<128x8xf32>
    %37 = math.exp %36 : vector<128x8xf32>
    %cst_19 = arith.constant dense<0.000000e+00> : vector<128xf32>
    %38 = vector.multi_reduction <add>, %37, %cst_19 [1] : vector<128x8xf32> to vector<128xf32>
    %39 = vector.shape_cast %38 : vector<128xf32> to vector<128x1xf32>
    %40 = vector.broadcast %39 : vector<128x1xf32> to vector<128x8xf32>
    %41 = arith.divf %37, %40 : vector<128x8xf32>
    %c0_20 = arith.constant 0 : index
    %c0_21 = arith.constant 0 : index
    %c0_22 = arith.constant 0 : index
    %42 = vector.load %arg10[%c0_20, %c0_21, %c0_22] : memref<1x128x8xf32, #tpu.memory_space<vmem>>, vector<1x128x8xf32>
    %43 = vector.shape_cast %42 : vector<1x128x8xf32> to vector<128x8xf32>
    %44 = vector.shape_cast %41 : vector<128x8xf32> to vector<1x128x8xf32>
    tpu.vector_store %arg10[%c0_20, %c0_21, %c0_22], %44 {strides = array<i32>} : memref<1x128x8xf32, #tpu.memory_space<vmem>>, vector<1x128x8xf32>,
    %c0_23 = arith.constant 0 : index
    %c0_24 = arith.constant 0 : index
    %45 = vector.load %arg6[%c0_23, %c0_24] : memref<8x64xf32, #tpu.memory_space<vmem>>, vector<8x64xf32>
    %cst_25 = arith.constant dense<0.000000e+00> : vector<128x64xf32>
    %46 = tpu.matmul %41, %45, %cst_25 {dimension_numbers = #tpu.dot_dimension_numbers<[1], [0], [0], [1], [0, 0, 1, 1], [], []>} : vector<128x8xf32>, vector<8x64xf32>, vector<128x64xf32> -> vector<128x64xf32>
    %47 = arith.addf %29, %46 : vector<128x64xf32>
    %cst_26 = arith.constant 0.000000e+00 : f32
    %48 = vector.broadcast %cst_26 : f32 to vector<128x64xf32>
    %49 = arith.maximumf %47, %48 : vector<128x64xf32>
    %cst_27 = arith.constant dense<0.000000e+00> : vector<64xf32>
    %50 = vector.multi_reduction <add>, %49, %cst_27 [0] : vector<128x64xf32> to vector<64xf32>
    %51 = vector.shape_cast %50 : vector<64xf32> to vector<1x64xf32>
    %cst_28 = arith.constant 1.280000e+02 : f32
    %52 = vector.broadcast %cst_28 : f32 to vector<1x64xf32>
    %53 = arith.divf %51, %52 : vector<1x64xf32>
    %c0_29 = arith.constant 0 : index
    %c0_30 = arith.constant 0 : index
    %c0_31 = arith.constant 0 : index
    %54 = vector.load %arg11[%c0_29, %c0_30, %c0_31] : memref<1x1x64xf32, #tpu.memory_space<vmem>>, vector<1x1x64xf32>
    %55 = vector.shape_cast %54 : vector<1x1x64xf32> to vector<1x64xf32>
    %56 = vector.shape_cast %53 : vector<1x64xf32> to vector<1x1x64xf32>
    tpu.vector_store %arg11[%c0_29, %c0_30, %c0_31], %56 {strides = array<i32>} : memref<1x1x64xf32, #tpu.memory_space<vmem>>, vector<1x1x64xf32>,
    %c0_32 = arith.constant 0 : index
    %c0_33 = arith.constant 0 : index
    %57 = vector.load %arg7[%c0_32, %c0_33] : memref<64x256xf32, #tpu.memory_space<vmem>>, vector<64x256xf32>
    %cst_34 = arith.constant dense<0.000000e+00> : vector<1x256xf32>
    %58 = tpu.matmul %53, %57, %cst_34 {dimension_numbers = #tpu.dot_dimension_numbers<[1], [0], [0], [1], [0, 0, 1, 1], [], []>} : vector<1x64xf32>, vector<64x256xf32>, vector<1x256xf32> -> vector<1x256xf32>
    %c0_35 = arith.constant 0 : index
    %c0_36 = arith.constant 0 : index
    %59 = vector.load %arg8[%c0_35, %c0_36] : memref<1x256xf32, #tpu.memory_space<vmem>>, vector<1x256xf32>
    %60 = arith.addf %58, %59 : vector<1x256xf32>
    %c0_37 = arith.constant 0 : index
    %c0_38 = arith.constant 0 : index
    %c0_39 = arith.constant 0 : index
    %61 = vector.load %arg12[%c0_37, %c0_38, %c0_39] : memref<1x1x256xf32, #tpu.memory_space<vmem>>, vector<1x1x256xf32>
    %62 = vector.shape_cast %61 : vector<1x1x256xf32> to vector<1x256xf32>
    %63 = vector.shape_cast %60 : vector<1x256xf32> to vector<1x1x256xf32>
    tpu.vector_store %arg12[%c0_37, %c0_38, %c0_39], %63 {strides = array<i32>} : memref<1x1x256xf32, #tpu.memory_space<vmem>>, vector<1x1x256xf32>,
    %cst_40 = arith.constant dense<0xFF800000> : vector<16xf32>
    %64 = vector.multi_reduction <maximumf>, %31, %cst_40 [0] : vector<128x16xf32> to vector<16xf32>
    %65 = vector.shape_cast %64 : vector<16xf32> to vector<1x16xf32>
    %66 = vector.broadcast %65 : vector<1x16xf32> to vector<128x16xf32>
    %67 = arith.subf %31, %66 : vector<128x16xf32>
    %68 = math.exp %67 : vector<128x16xf32>
    %cst_41 = arith.constant dense<0.000000e+00> : vector<16xf32>
    %69 = vector.multi_reduction <add>, %68, %cst_41 [0] : vector<128x16xf32> to vector<16xf32>
    %70 = vector.shape_cast %69 : vector<16xf32> to vector<1x16xf32>
    %cst_42 = arith.constant 1.000000e-10 : f32
    %71 = vector.broadcast %cst_42 : f32 to vector<1x16xf32>
    %72 = arith.addf %70, %71 : vector<1x16xf32>
    %73 = vector.broadcast %72 : vector<1x16xf32> to vector<128x16xf32>
    %74 = arith.divf %68, %73 : vector<128x16xf32>
    %cst_43 = arith.constant dense<0.000000e+00> : vector<16x3xf32>
    %75 = tpu.matmul %74, %32, %cst_43 {dimension_numbers = #tpu.dot_dimension_numbers<[0], [0], [1], [1], [0, 1, 1, 1], [], []>} : vector<128x16xf32>, vector<128x3xf32>, vector<16x3xf32> -> vector<16x3xf32>
    %76 = vector.broadcast %16 : vector<1x1xf32> to vector<16x3xf32>
    %77 = arith.mulf %75, %76 : vector<16x3xf32>
    %c0_44 = arith.constant 0 : index
    %c0_45 = arith.constant 0 : index
    %c0_46 = arith.constant 0 : index
    %78 = vector.load %arg13[%c0_44, %c0_45, %c0_46] : memref<1x16x3xf32, #tpu.memory_space<vmem>>, vector<1x16x3xf32>
    %79 = vector.shape_cast %78 : vector<1x16x3xf32> to vector<16x3xf32>
    %80 = vector.shape_cast %77 : vector<16x3xf32> to vector<1x16x3xf32>
    tpu.vector_store %arg13[%c0_44, %c0_45, %c0_46], %80 {strides = array<i32>} : memref<1x16x3xf32, #tpu.memory_space<vmem>>, vector<1x16x3xf32>,
    return
  }
  func.func @transform_0(%arg0: i32) -> (i32, i32, i32) {
    %c0_i32 = arith.constant 0 : i32
    %c0_i32_0 = arith.constant 0 : i32
    %c0_i32_1 = arith.constant 0 : i32
    return %arg0, %c0_i32, %c0_i32_0 : i32, i32, i32
  }
  func.func @transform_1(%arg0: i32) -> (i32, i32, i32) {
    %c0_i32 = arith.constant 0 : i32
    %c0_i32_0 = arith.constant 0 : i32
    %c0_i32_1 = arith.constant 0 : i32
    return %arg0, %c0_i32, %c0_i32_0 : i32, i32, i32
  }
  func.func @transform_2(%arg0: i32) -> (i32, i32) {
    %c0_i32 = arith.constant 0 : i32
    %c0_i32_0 = arith.constant 0 : i32
    %c0_i32_1 = arith.constant 0 : i32
    return %c0_i32, %c0_i32_0 : i32, i32
  }
  func.func @transform_3(%arg0: i32) -> (i32, i32) {
    %c0_i32 = arith.constant 0 : i32
    %c0_i32_0 = arith.constant 0 : i32
    %c0_i32_1 = arith.constant 0 : i32
    return %c0_i32, %c0_i32_0 : i32, i32
  }
  func.func @transform_4(%arg0: i32) -> (i32, i32) {
    %c0_i32 = arith.constant 0 : i32
    %c0_i32_0 = arith.constant 0 : i32
    %c0_i32_1 = arith.constant 0 : i32
    return %c0_i32, %c0_i32_0 : i32, i32
  }
  func.func @transform_5(%arg0: i32) -> (i32, i32) {
    %c0_i32 = arith.constant 0 : i32
    %c0_i32_0 = arith.constant 0 : i32
    %c0_i32_1 = arith.constant 0 : i32
    return %c0_i32, %c0_i32_0 : i32, i32
  }
  func.func @transform_6(%arg0: i32) -> (i32, i32) {
    %c0_i32 = arith.constant 0 : i32
    %c0_i32_0 = arith.constant 0 : i32
    %c0_i32_1 = arith.constant 0 : i32
    return %c0_i32, %c0_i32_0 : i32, i32
  }
  func.func @transform_7(%arg0: i32) -> (i32, i32) {
    %c0_i32 = arith.constant 0 : i32
    %c0_i32_0 = arith.constant 0 : i32
    %c0_i32_1 = arith.constant 0 : i32
    return %c0_i32, %c0_i32_0 : i32, i32
  }
  func.func @transform_8(%arg0: i32) -> (i32, i32, i32) {
    %c0_i32 = arith.constant 0 : i32
    %c0_i32_0 = arith.constant 0 : i32
    %c0_i32_1 = arith.constant 0 : i32
    return %arg0, %c0_i32, %c0_i32_0 : i32, i32, i32
  }
  func.func @transform_9(%arg0: i32) -> (i32, i32, i32) {
    %c0_i32 = arith.constant 0 : i32
    %c0_i32_0 = arith.constant 0 : i32
    %c0_i32_1 = arith.constant 0 : i32
    return %arg0, %c0_i32, %c0_i32_0 : i32, i32, i32
  }
  func.func @transform_10(%arg0: i32) -> (i32, i32, i32) {
    %c0_i32 = arith.constant 0 : i32
    %c0_i32_0 = arith.constant 0 : i32
    %c0_i32_1 = arith.constant 0 : i32
    return %arg0, %c0_i32, %c0_i32_0 : i32, i32, i32
  }
  func.func @transform_11(%arg0: i32) -> (i32, i32, i32) {
    %c0_i32 = arith.constant 0 : i32
    %c0_i32_0 = arith.constant 0 : i32
    %c0_i32_1 = arith.constant 0 : i32
    return %arg0, %c0_i32, %c0_i32_0 : i32, i32, i32
  }
  func.func @transform_12(%arg0: i32) -> (i32, i32, i32) {
    %c0_i32 = arith.constant 0 : i32
    %c0_i32_0 = arith.constant 0 : i32
    %c0_i32_1 = arith.constant 0 : i32
    return %arg0, %c0_i32, %c0_i32_0 : i32, i32, i32
  }
}

</mosaic_0001>

<bundles_post_ra>
// kernel: tpu_custom_call.1
= control target key start
LH: loop header
LB: loop body
LE: loop exit
PB: predicated region body
PF: predicated region fallthrough
CT: control target
= control target key end

     0   :  { %s3737_s0 = inlined_call_operand.vmem [shape: f32[2,1,128], index: 0, kind: input, shape index: {}]   ;;  %s3738_s1 = inlined_call_operand.vmem [shape: f32[2,128,64], index: 1, kind: input, shape index: {}]   ;;  %s3739_s2 = inlined_call_operand.vmem [shape: bf16[64,128], index: 2, kind: input, shape index: {}]   ;;  %s3740_s3 = inlined_call_operand.vmem [shape: f32[128,128], index: 3, kind: input, shape index: {}]   ;;  %s3741_s4 = inlined_call_operand.vmem [shape: f32[1,128], index: 4, kind: input, shape index: {}]   ;;  %s3742_s5 = inlined_call_operand.vmem [shape: f32[8,64], index: 5, kind: input, shape index: {}]   ;;  %s3743_s6 = inlined_call_operand.vmem [shape: f32[64,256], index: 6, kind: input, shape index: {}]   ;;  %s3744_s7 = inlined_call_operand.vmem [shape: f32[1,256], index: 7, kind: input, shape index: {}]   ;;  %s3745_s8 = inlined_call_operand.hbm [shape: f32[2,1,128], index: 8, kind: output, shape index: {0}]   ;;  %s3746_s9 = inlined_call_operand.vmem [shape: f32[2,128,8], index: 9, kind: output, shape index: {1}]   ;;  %s3747_s10 = inlined_call_operand.hbm [shape: f32[2,1,64], index: 10, kind: output, shape index: {2}]   ;;  %s3748_s11 = inlined_call_operand.hbm [shape: f32[2,1,256], index: 11, kind: output, shape index: {3}]   ;;  %s3749_s12 = inlined_call_operand.vmem [shape: f32[2,16,3], index: 12, kind: output, shape index: {4}]  }
   0x1   :  { %3755 = sst [smem:[#allocation11_spill]] %s3737_s0 }
   0x2   :  { %3756 = sst [smem:[#allocation12_spill]] %s3738_s1 }
   0x3   :  { %3757 = sst [smem:[#allocation13_spill]] %s3739_s2 }
   0x4   :  { %3758 = sst [smem:[#allocation14_spill]] %s3740_s3 }
   0x5   :  { %18 = vsyncpa [#allocation3], 0 }
   0x6   :  { %20 = vsyncpa [#allocation3 + $0x1], 0 }
   0x7   :  { %21 = vsyncpa [#allocation5], 0 }
   0x8   :  { %23 = vsyncpa [#allocation5 + $0x1], 0  ;;  %s2856_s21 = smov 0   ;;  %s2858_s22 = smov 0  }
   0x9   :  { %s2860_s23 = smov 0   ;;  %s2862_s24 = smov 0  }
   0xa LB: > { %s2877_s25 = sadd.s32 4294967295, %s2779_s24   ;;  %s3750_s26 = sadd.s32 4294967294, %s2779_s24   ;;  %s2779_s24 = sphi %s2862_s24, %s3776_s24   ;;  %s2775_s23 = sphi %s2860_s23, %s3775_s23   ;;  %s2771_s22 = sphi %s2858_s22, %s3774_s22   ;;  %s2767_s21 = sphi %s2856_s21, %s3773_s21  }
   0xb   : > { %s2881_s27 = sadd.s32 1, %s2779_s24   ;;  %s214_s28 = sadd.s32 1, %s2775_s23 }
   0xc   : > { %s211_s29 = ssub.s32 %s2779_s24, %s2881_s27  ;;  %p224_p0 = scmp.ne.s32.totalorder %s2775_s23, %s2771_s22 }
   0xd   : > { %p212_p1 = scmp.eq.s32.totalorder %s211_s29, 0  ;;  %p225_p2 = scmp.eq.s32.totalorder %s2877_s25, 1 }
   0xe   : > { %p230_p3 = scmp.ne.s32.totalorder %s2771_s22, %s2767_s21  ;;  %p231_p4 = scmp.eq.s32.totalorder %s3750_s26, 1 }
   0xf   : > { %s2894_s30 = scalar_select %p212_p1, %s2775_s23, %s214_s28  }
  0x10   : > { %p2896_p5 = por %p225_p2, %p224_p0  ;;  %p2900_p6 = por %p231_p4, %p230_p3 }
  0x11   : > { %3759 = sst [smem:[#allocation9_spill]] %s2894_s30  ;;  %p2108_p7 = scmp.ge.s32.totalorder %s2779_s24, 1 }
  0x12   : > { %p385_p8 = scmp.lt.s32.totalorder %s2779_s24, 3 }
  0x14   : > { %p386_p9 = pnand %p2108_p7, %p385_p8 }
  0x16   : > { %389 = sbr.rel (%p386_p9) target bundleno = 1480 (0x5c8), region = 52 }
  0x1d   : > { %p448_p10 = scmp.lt.s32.totalorder %s2877_s25, 1  ;;  %s3762_s2 = sld [smem:[#allocation13_spill]]  ;;  %v2781_v2 = vmov 0.0|0.0   ;;  %vm469_vm0 = vcmask 1040384   ;;  %vm641_vm1 = vcmask 523264   ;;  %vm2782_vm2 = vmmov 0  }
  0x1e   : > { %2341 = vmatprep.subr.bf16.mxu0 %v2781_v2  ;;  %s3763_s3 = sld [smem:[#allocation14_spill]]  ;;  %s3764_s0 = sld [smem:[#allocation11_spill]]  ;;  %v2783_v45 = vmov 0.0   ;;  %vm786_vm5 = vcmask 589312   ;;  %vm1484_vm6 = vcmask 720448   ;;  %vm947_vm7 = vcmask 64512  }
  0x1f   : > { %s2911_s17 = scalar_select %p448_p10, %s2877_s25, 1  ;;  %2253 = vmatprep.mubr.msk.f32.mxu0 %vm2782_vm2, %v2783_v45  ;;  %vm1357_vm8 = vcmask 516096  }
  0x20   : > { %s3765_s1 = sld [smem:[#allocation12_spill]]  ;;  %s2784_s29 = smov 64  }
  0x21   : > { %s2153_s26 = sshll.u32 %s2911_s17, 7  ;;  %s2785_s18 = smov 56  }
  0x22   : > { %s2786_s19 = smov 40   ;;  %s1878_s15 = sand.u32 1, %s2877_s25  }
  0x23   : > { %v2549_v0 = vld [vmem:[%s3762_s2] sm:$0xff]   ;;  %v2550_v1 = vld [vmem:[%s3762_s2 + $0x8] sm:$0xff]   ;;  %v2551_v7 = vld [vmem:[%s3762_s2 + $0x10] sm:$0xff]   ;;  %s2147_s16 = sshll.u32 %s2877_s25, 4 }
  0x24   : > { %2256 = vmatprep.subr.bf16.mxu1 %v2549_v0  ;;  %v527_v3 = vld [vmem:[%s3763_s3] sm:$0xff]  ;;  %v528_v4 = vld [vmem:[%s3763_s3 + $0x8] sm:$0xff]  ;;  %s450_s30 = scalar_lea.vmem %s3764_s0, %s2911_s17  ;;  %v2552_v10 = vld [vmem:[%s3762_s2 + $0x18] sm:$0xff]   ;;  %s3632_s2 = scalar_lea.sflag [#allocation5], %s1878_s15 }
  0x25   : > { %2257 = vmatpush3.bf16.msra.mxu1 %v2549_v0  ;;  %v2342_v5 = vpack.c.bf16 %v528_v4, %v527_v3  ;;  %v2927_v6 = vld [vmem:[%s450_s30] sm:$0x1]  ;;  %v529_v11 = vld [vmem:[%s3763_s3 + $0x10] sm:$0xff]  ;;  %v530_v12 = vld [vmem:[%s3763_s3 + $0x18] sm:$0xff]  ;;  %s3623_s30 = scalar_lea.hbm %s3747_s10, %s2147_s16 }
  0x26   : > { %2258 = vmatprep.subr.bf16.mxu1 %v2550_v1  ;;  %v468_v8 = vmul.f32 %v2927_v6, %v2927_v6  ;;  %s2942_s28 = scalar_lea.vmem %s3765_s1, %s2153_s26  ;;  %v2345_v13 = vpack.c.bf16 %v530_v12, %v529_v11  ;;  %v531_v20 = vld [vmem:[%s3763_s3 + $0x20] sm:$0xff]  ;;  %v532_v21 = vld [vmem:[%s3763_s3 + $0x28] sm:$0xff]  ;;  %v533_v23 = vld [vmem:[%s3763_s3 + $0x30] sm:$0xff] }
  0x27   : > { %2343 = vmatpush3.bf16.msra.mxu0 %v2342_v5  ;;  %v495_v14 = vld [vmem:[%s2942_s28] sm:$0xff]  ;;  %v496_v15 = vld [vmem:[%s2942_s28 + $0x8] sm:$0xff]  ;;  %v497_v17 = vld [vmem:[%s2942_s28 + $0x10] sm:$0xff]  ;;  %v2348_v22 = vpack.c.bf16 %v532_v21, %v531_v20 }
  0x28   : > { %2344 = vmatprep.subr.bf16.mxu0 %v2781_v2  ;;  %v470_v9 = vsel %vm469_vm0, %v468_v8, 0.0  ;;  %v511_v16 = vpack.c.bf16 %v496_v15, %v495_v14  ;;  %v498_v18 = vld [vmem:[%s2942_s28 + $0x18] sm:$0xff]  ;;  %v499_v26 = vld [vmem:[%s2942_s28 + $0x20] sm:$0xff]  ;;  %v500_v27 = vld [vmem:[%s2942_s28 + $0x28] sm:$0xff] }
  0x29   : > { %2259 = vmatpush3.bf16.msra.mxu1 %v2550_v1  ;;  %471 = vadd.xlane.f32.xlu0 %v470_v9  ;;  %v512_v19 = vpack.c.bf16 %v498_v18, %v497_v17  ;;  %v534_v24 = vld [vmem:[%s3763_s3 + $0x38] sm:$0xff]  ;;  %v513_v28 = vpack.c.bf16 %v500_v27, %v499_v26  ;;  %v501_v29 = vld [vmem:[%s2942_s28 + $0x30] sm:$0xff]  ;;  %v535_v32 = vld [vmem:[%s3763_s3 + $0x40] sm:$0xff]  ;;  %v3751_v18 = vlaneseq }
  0x2a   : > { %2260 = vmatprep.subr.bf16.mxu1 %v2551_v7  ;;  %2264 = vmatprep.mubr.msk.bf16.mxu1 %vm641_vm1, %v511_v16  ;;  %v2351_v25 = vpack.c.bf16 %v534_v24, %v533_v23  ;;  %v502_v30 = vld [vmem:[%s2942_s28 + $0x38] sm:$0xff]  ;;  %v536_v33 = vld [vmem:[%s3763_s3 + $0x48] sm:$0xff]  ;;  %v537_v35 = vld [vmem:[%s3763_s3 + $0x50] sm:$0xff] }
  0x2b   : > { %2346 = vmatpush3.bf16.msra.mxu0 %v2345_v13  ;;  %v514_v31 = vpack.c.bf16 %v502_v30, %v501_v29  ;;  %v2354_v34 = vpack.c.bf16 %v536_v33, %v535_v32  ;;  %v538_v36 = vld [vmem:[%s3763_s3 + $0x58] sm:$0xff]  ;;  %v503_v38 = vld [vmem:[%s2942_s28 + $0x40] sm:$0xff]  ;;  %v504_v39 = vld [vmem:[%s2942_s28 + $0x48] sm:$0xff] }
  0x2c   : > { %2347 = vmatprep.subr.bf16.mxu0 %v2781_v2  ;;  %v2357_v37 = vpack.c.bf16 %v538_v36, %v537_v35  ;;  %v505_v40 = vld [vmem:[%s2942_s28 + $0x50] sm:$0xff]  ;;  %v515_v41 = vpack.c.bf16 %v504_v39, %v503_v38  ;;  %v506_v42 = vld [vmem:[%s2942_s28 + $0x58] sm:$0xff]  ;;  %v539_v43 = vld [vmem:[%s3763_s3 + $0x60] sm:$0xff] }
  0x2d   : > { %2261 = vmatpush3.bf16.msra.mxu1 %v2551_v7  ;;  %v540_v44 = vld [vmem:[%s3763_s3 + $0x68] sm:$0xff]  ;;  %v516_v46 = vpack.c.bf16 %v506_v42, %v505_v40  ;;  %v507_v48 = vld [vmem:[%s2942_s28 + $0x60] sm:$0xff]  ;;  %v541_v49 = vld [vmem:[%s3763_s3 + $0x70] sm:$0xff] }
  0x2e   : > { %2262 = vmatprep.subr.bf16.mxu1 %v2552_v10  ;;  %v2360_v47 = vpack.c.bf16 %v540_v44, %v539_v43  ;;  %v542_v50 = vld [vmem:[%s3763_s3 + $0x78] sm:$0xff]  ;;  %v508_v51 = vld [vmem:[%s2942_s28 + $0x68] sm:$0xff]  ;;  %v509_v53 = vld [vmem:[%s2942_s28 + $0x70] sm:$0xff] }
  0x2f   : > { %2349 = vmatpush3.bf16.msra.mxu0 %v2348_v22  ;;  %v517_v52 = vpack.c.bf16 %v508_v51, %v507_v48  ;;  %v510_v54 = vld [vmem:[%s2942_s28 + $0x78] sm:$0xff]  ;;  %v2363_v55 = vpack.c.bf16 %v542_v50, %v541_v49  ;;  %s3020_s28 = sand.u32 1, %s2771_s22   ;;  %v3044_v24 = vld [vmem:[%s3741_s4] ss:$0 sm:$0xff] }
  0x30   : > { %2350 = vmatprep.subr.bf16.mxu0 %v2781_v2  ;;  %v518_v56 = vpack.c.bf16 %v510_v54, %v509_v53  ;;  %s3754_s0 = scalar_lea.vmem [#allocation2], %s3020_s28 }
  0x31   : > { %2263 = vmatpush3.bf16.msra.mxu1 %v2552_v10 }
  0x33   : > { %2352 = vmatpush3.bf16.msra.mxu0 %v2351_v25 }
  0x34   : > { %2265 = vmatmul.mubr.msk.bf16.vlgmr.msra.gmra.mrb[0].mxu1 %vm641_vm1, %v512_v19  ;;  %2353 = vmatprep.subr.bf16.mxu0 %v2781_v2  ;;  %v3033_v19 = vshrl.u32 %v3751_v18, 7 }
  0x35   : > { %2268 = vmatprep.mubr.msk.bf16.mxu1 %vm641_vm1, %v513_v28 }
  0x36   : > { %3766 = vst [vmem:[#allocation10_spill] sm:$0xff] %v3033_v19  ;;  %v3036_v20 = vsub.s32 0, %v3033_v19 }
  0x37   : > { %2355 = vmatpush3.bf16.msra.mxu0 %v2354_v34 }
  0x38   : > { %2356 = vmatprep.subr.bf16.mxu0 %v2781_v2 }
  0x3b   : > { %2358 = vmatpush3.bf16.msra.mxu0 %v2357_v37 }
  0x3c   : > { %2269 = vmatmul.mubr.msk.bf16.gmra.mrb[4].mxu1 %vm641_vm1, %v514_v31  ;;  %2359 = vmatprep.subr.bf16.mxu0 %v2781_v2 }
  0x3d   : > { %2272 = vmatprep.mubr.msk.bf16.mxu1 %vm641_vm1, %v515_v41 }
  0x3f   : > { %2361 = vmatpush3.bf16.msra.mxu0 %v2360_v47 }
  0x40   : > { %2362 = vmatprep.subr.bf16.mxu0 %v2781_v2 }
  0x43   : > { %2364 = vmatpush3.bf16.msra.mxu0 %v2363_v55 }
  0x44   : > { %2273 = vmatmul.mubr.msk.bf16.gmra.mrb[8].mxu1 %vm641_vm1, %v516_v46 }
  0x45   : > { %2276 = vmatprep.mubr.msk.bf16.mxu1 %vm641_vm1, %v517_v52 }
  0x4c   : > { %2277 = vmatmul.mubr.msk.bf16.gmra.mrb[12].mxu1 %vm641_vm1, %v518_v56 }
  0x4d   : > { %1454 = vmatprep.mubr.f32.mxu1 %v2783_v45 }
  0xb6   : > { %v472_v57 = vpop.xlane.xlu0 %471 }
  0xb7   : > { %2553 = vrsqrt.f32 %v472_v57  ;;  %vm475_vm3 = vcmp.eq.f32.partialorder %v472_v57, inf  ;;  %v478_v60 = vand.u32 2147483648, %v472_v57  ;;  %vm477_vm4 = vcmp.eq.f32.partialorder %v472_v57, 0.0 }
  0xc1   : > { %v2554_v58 = vpop.eup %2553 }
  0xc2   : > { %v474_v59 = vmul.f32 %v2554_v58, %v472_v57 }
  0xc4   : > { %v476_v61 = vsel %vm475_vm3, %v472_v57, %v474_v59 }
  0xc5   : > { %v479_v62 = vsel %vm477_vm4, %v478_v60, %v476_v61 }
  0xc6   : > { %v480_v63 = vadd.f32 1e-10, %v479_v62 }
  0xc8   : > { %2555 = vrcp.f32 %v480_v63 }
  0xd2   : > { %v2556_v0 = vpop.eup %2555 }
  0xd3   : > { %v3023_v1 = vmul.f32 %v2556_v0, %v2927_v6 }
  0xd5   : > { %2254 = vmatmul.mubr.f32.vlgmr.msra.gmra.mrb[0].mxu0 %v3023_v1  ;;  %483 = vst [vmem:[%s3754_s0] sm:$0x1] %v3023_v1  ;;  %s3630_s0 = scalar_lea.hbm %s3745_s8, %s2147_s16 }
 0x107   : > { %v2266_v2 = vpop.f32.mrb[0].mxu1 }
 0x108   : > { %v700_v3 = vpop.f32.mrb[1].mxu1 }
 0x109   : > { %v2267_v4 = vpop.f32.mrb[2].mxu1 }
 0x10a   : > { %v703_v5 = vpop.f32.mrb[3].mxu1 }
 0x10f   : > { %v2270_v7 = vpop.f32.mrb[4].mxu1 }
 0x110   : > { %v716_v8 = vpop.f32.mrb[5].mxu1 }
 0x111   : > { %v2271_v9 = vpop.f32.mrb[6].mxu1 }
 0x112   : > { %v719_v10 = vpop.f32.mrb[7].mxu1 }
 0x117   : > { %v2274_v11 = vpop.f32.mrb[8].mxu1 }
 0x118   : > { %v732_v12 = vpop.f32.mrb[9].mxu1 }
 0x119   : > { %v2275_v13 = vpop.f32.mrb[10].mxu1 }
 0x11a   : > { %v735_v14 = vpop.f32.mrb[11].mxu1 }
 0x11f   : > { %v3030_v6 = vpop.f32.mrb[12].mxu1 }
 0x120   : > { %v748_v15 = vpop.f32.mrb[13].mxu1 }
 0x121   : > { %v2279_v16 = vpop.f32.mrb[14].mxu1 }
 0x122   : > { %v751_v17 = vpop.f32.mrb[15].mxu1 }
 0x1a8   : > { %v609_v21 = vpop.f32.mrb[0].mxu0 }
 0x1a9   : > { %v3039_v22 = vrot.slane %v609_v21, %v3036_v20  ;;  %v2255_v23 = vpop.f32.mrb[1].mxu0 }
 0x1ab   : > { %v749_v25 = vadd.f32 %v748_v15, %v3039_v22  ;;  %v760_v26 = vadd.f32 %v2279_v16, %v3039_v22  ;;  %v752_v27 = vadd.f32 %v751_v17, %v3039_v22  ;;  %v704_v28 = vadd.f32 %v703_v5, %v3039_v22 }
 0x1ac   : > { %v701_v29 = vadd.f32 %v700_v3, %v3039_v22  ;;  %v709_v30 = vadd.f32 %v2266_v2, %v3039_v22  ;;  %v712_v31 = vadd.f32 %v2267_v4, %v3039_v22  ;;  %v717_v32 = vadd.f32 %v716_v8, %v3039_v22 }
 0x1ad   : > { %v3055_v33 = vadd.f32 %v3044_v24, %v704_v28  ;;  %v3074_v40 = vadd.f32 %v3044_v24, %v749_v25  ;;  %v720_v45 = vadd.f32 %v719_v10, %v3039_v22  ;;  %v725_v46 = vadd.f32 %v2270_v7, %v3039_v22 }
 0x1ae   : > { %v3058_v34 = vadd.f32 %v3044_v24, %v701_v29  ;;  %v3061_v35 = vadd.f32 %v3044_v24, %v709_v30  ;;  %v3064_v36 = vadd.f32 %v3044_v24, %v717_v32  ;;  %v3069_v38 = vadd.f32 %v3044_v24, %v712_v31 }
 0x1af   : > { %v790_v37 = vsel %vm786_vm5, %v3055_v33, -inf  ;;  %v1486_v41 = vsel %vm1484_vm6, %v3055_v33, -inf  ;;  %v728_v47 = vadd.f32 %v2271_v9, %v3039_v22  ;;  %v733_v49 = vadd.f32 %v732_v12, %v3039_v22 }
 0x1b0   : > { %791 = vmax.xlane.f32.xlu1 %v790_v37  ;;  %v787_v39 = vsel %vm786_vm5, %v3058_v34, -inf  ;;  %v1485_v42 = vsel %vm1484_vm6, %v3058_v34, -inf  ;;  %v793_v43 = vsel %vm786_vm5, %v3061_v35, -inf  ;;  %v1489_v44 = vsel %vm1484_vm6, %v3064_v36, -inf }
 0x1b1   : > { %788 = vmax.xlane.f32.xlu0 %v787_v39  ;;  %v796_v48 = vsel %vm786_vm5, %v3069_v38, -inf  ;;  %v736_v50 = vadd.f32 %v735_v14, %v3039_v22  ;;  %v741_v51 = vadd.f32 %v2274_v11, %v3039_v22  ;;  %v3093_v52 = vadd.f32 %v3044_v24, %v720_v45 }
 0x1b2   : > { %v3096_v53 = vadd.f32 %v3044_v24, %v725_v46  ;;  %v3099_v54 = vadd.f32 %v3044_v24, %v728_v47  ;;  %v744_v55 = vadd.f32 %v2275_v13, %v3039_v22  ;;  %v1487_v56 = vsel %vm1484_vm6, %v3061_v35, -inf }
 0x1b3   : > { %v1490_v57 = vmax.f32 %v1485_v42, %v1489_v44  ;;  %v3105_v58 = vadd.f32 %v3044_v24, %v733_v49  ;;  %v3108_v59 = vadd.f32 %v3044_v24, %v736_v50  ;;  %v3111_v60 = vadd.f32 %v3044_v24, %v752_v27 }
 0x1b4   : > { %794 = vmax.xlane.f32.xlu1 %v793_v43  ;;  %v1488_v61 = vsel %vm1484_vm6, %v3069_v38, -inf  ;;  %v1491_v62 = vsel %vm1484_vm6, %v3093_v52, -inf  ;;  %v1493_v63 = vsel %vm1484_vm6, %v3096_v53, -inf  ;;  %v799_v0 = vsel %vm786_vm5, %v3064_v36, -inf }
 0x1b5   : > { %797 = vmax.xlane.f32.xlu0 %v796_v48  ;;  %v1492_v2 = vmax.f32 %v1486_v41, %v1491_v62  ;;  %v1495_v3 = vsel %vm1484_vm6, %v3099_v54, -inf  ;;  %v3124_v4 = vadd.f32 %v3044_v24, %v741_v51  ;;  %v802_v5 = vsel %vm786_vm5, %v3093_v52, -inf }
 0x1b6   : > { %v1494_v7 = vmax.f32 %v1487_v56, %v1493_v63  ;;  %v1497_v8 = vsel %vm1484_vm6, %v3105_v58, -inf  ;;  %v3131_v9 = vadd.f32 %v3044_v24, %v760_v26  ;;  %v1496_v10 = vmax.f32 %v1488_v61, %v1495_v3 }
 0x1b7   : > { %v1498_v11 = vmax.f32 %v1490_v57, %v1497_v8  ;;  %v1499_v12 = vsel %vm1484_vm6, %v3108_v59, -inf  ;;  %v1505_v13 = vsel %vm1484_vm6, %v3074_v40, -inf  ;;  %v1507_v14 = vsel %vm1484_vm6, %v3111_v60, -inf }
 0x1b8   : > { %800 = vmax.xlane.f32.xlu1 %v799_v0  ;;  %v1500_v15 = vmax.f32 %v1492_v2, %v1499_v12  ;;  %v3140_v16 = vadd.f32 %v3044_v24, %v744_v55  ;;  %v805_v17 = vsel %vm786_vm5, %v3096_v53, -inf  ;;  %v808_v21 = vsel %vm786_vm5, %v3099_v54, -inf }
 0x1b9   : > { %803 = vmax.xlane.f32.xlu0 %v802_v5  ;;  %v1501_v23 = vsel %vm1484_vm6, %v3124_v4, -inf  ;;  %v757_v25 = vadd.f32 %v3030_v6, %v3039_v22  ;;  %v1506_v26 = vmax.f32 %v1498_v11, %v1505_v13  ;;  %v1511_v32 = vsel %vm1484_vm6, %v3131_v9, -inf }
 0x1ba   : > { %v1508_v27 = vmax.f32 %v1500_v15, %v1507_v14  ;;  %v1502_v28 = vmax.f32 %v1494_v7, %v1501_v23  ;;  %v1503_v29 = vsel %vm1484_vm6, %v3140_v16, -inf  ;;  %v811_v37 = vsel %vm786_vm5, %v3105_v58, -inf }
 0x1bb   : > { %v1504_v30 = vmax.f32 %v1496_v10, %v1503_v29  ;;  %v3153_v31 = vadd.f32 %v3044_v24, %v757_v25  ;;  %v814_v22 = vsel %vm786_vm5, %v3108_v59, -inf  ;;  %v817_v24 = vsel %vm786_vm5, %v3124_v4, -inf }
 0x1bc   : > { %806 = vmax.xlane.f32.xlu1 %v805_v17  ;;  %v1513_v41 = vmax.f32 %v1506_v26, %v1508_v27  ;;  %v820_v44 = vsel %vm786_vm5, %v3140_v16, -inf  ;;  %v823_v47 = vsel %vm786_vm5, %v3074_v40, -inf  ;;  %v826_v48 = vsel %vm786_vm5, %v3111_v60, -inf }
 0x1bd   : > { %809 = vmax.xlane.f32.xlu0 %v808_v21  ;;  %v1512_v39 = vmax.f32 %v1504_v30, %v1511_v32  ;;  %v1509_v6 = vsel %vm1484_vm6, %v3153_v31, -inf  ;;  %v829_v51 = vsel %vm786_vm5, %v3153_v31, -inf  ;;  %v832_v56 = vsel %vm786_vm5, %v3131_v9, -inf }
 0x1be   : > { %v1510_v42 = vmax.f32 %v1502_v28, %v1509_v6 }
 0x1c0   : > { %812 = vmax.xlane.f32.xlu1 %v811_v37  ;;  %v1514_v43 = vmax.f32 %v1510_v42, %v1512_v39 }
 0x1c1   : > { %815 = vmax.xlane.f32.xlu0 %v814_v22 }
 0x1c2   : > { %v1515_v45 = vmax.f32 %v1513_v41, %v1514_v43 }
 0x1c4   : > { %818 = vmax.xlane.f32.xlu1 %v817_v24  ;;  %v1516_v46 = vrot.slane %v1515_v45, 4 }
 0x1c5   : > { %821 = vmax.xlane.f32.xlu0 %v820_v44 }
 0x1c6   : > { %v1517_v49 = vmax.f32 %v1515_v45, %v1516_v46 }
 0x1c8   : > { %824 = vmax.xlane.f32.xlu1 %v823_v47  ;;  %v1518_v50 = vrot.slane %v1517_v49, 2 }
 0x1c9   : > { %827 = vmax.xlane.f32.xlu0 %v826_v48 }
 0x1ca   : > { %v1519_v55 = vmax.f32 %v1517_v49, %v1518_v50 }
 0x1cc   : > { %830 = vmax.xlane.f32.xlu1 %v829_v51  ;;  %v1520_v57 = vrot.slane %v1519_v55, 1 }
 0x1cd   : > { %833 = vmax.xlane.f32.xlu0 %v832_v56 }
 0x1ce   : > { %v3175_v61 = vmax.f32 %v1519_v55, %v1520_v57 }
 0x1d0   : > { %v1522_v62 = vsub.f32 %v3058_v34, %v3175_v61  ;;  %v1523_v63 = vsub.f32 %v3055_v33, %v3175_v61  ;;  %v1524_v0 = vsub.f32 %v3061_v35, %v3175_v61  ;;  %v1525_v2 = vsub.f32 %v3069_v38, %v3175_v61 }
 0x1d1   : > { %v1526_v3 = vsub.f32 %v3064_v36, %v3175_v61  ;;  %v1527_v7 = vsub.f32 %v3093_v52, %v3175_v61  ;;  %v1528_v12 = vsub.f32 %v3096_v53, %v3175_v61  ;;  %v1529_v14 = vsub.f32 %v3099_v54, %v3175_v61 }
 0x1d2   : > { %v1538_v5 = vmul.f32 1.442695, %v1522_v62  ;;  %v1540_v8 = vmul.f32 1.442695, %v1523_v63  ;;  %v1542_v10 = vmul.f32 1.442695, %v1524_v0  ;;  %v1530_v17 = vsub.f32 %v3105_v58, %v3175_v61 }
 0x1d3   : > { %v1544_v11 = vmul.f32 1.442695, %v1525_v2  ;;  %v1546_v13 = vmul.f32 1.442695, %v1526_v3  ;;  %v1548_v15 = vmul.f32 1.442695, %v1527_v7  ;;  %v1531_v23 = vsub.f32 %v3108_v59, %v3175_v61 }
 0x1d4   : > { %2557 = vpow2.f32 %v1538_v5  ;;  %v1550_v21 = vmul.f32 1.442695, %v1528_v12  ;;  %v1552_v25 = vmul.f32 1.442695, %v1529_v14  ;;  %v1532_v26 = vsub.f32 %v3124_v4, %v3175_v61 }
 0x1d5   : > { %2559 = vpow2.f32 %v1540_v8  ;;  %v1554_v27 = vmul.f32 1.442695, %v1530_v17  ;;  %v1533_v30 = vsub.f32 %v3140_v16, %v3175_v61  ;;  %v1556_v32 = vmul.f32 1.442695, %v1531_v23 }
 0x1d6   : > { %2561 = vpow2.f32 %v1542_v10  ;;  %v1534_v41 = vsub.f32 %v3074_v40, %v3175_v61  ;;  %v1558_v42 = vmul.f32 1.442695, %v1532_v26  ;;  %v1535_v45 = vsub.f32 %v3111_v60, %v3175_v61 }
 0x1d7   : > { %2563 = vpow2.f32 %v1544_v11  ;;  %v1560_v46 = vmul.f32 1.442695, %v1533_v30  ;;  %v1536_v50 = vsub.f32 %v3153_v31, %v3175_v61  ;;  %v1537_v63 = vsub.f32 %v3131_v9, %v3175_v61 }
 0x1d8   : > { %2565 = vpow2.f32 %v1546_v13  ;;  %v1562_v51 = vmul.f32 1.442695, %v1534_v41  ;;  %v1564_v62 = vmul.f32 1.442695, %v1535_v45 }
 0x1d9   : > { %2567 = vpow2.f32 %v1548_v15  ;;  %v1566_v5 = vmul.f32 1.442695, %v1536_v50  ;;  %v1568_v11 = vmul.f32 1.442695, %v1537_v63 }
 0x1da   : > { %2569 = vpow2.f32 %v1550_v21 }
 0x1db   : > { %2571 = vpow2.f32 %v1552_v25 }
 0x1dc   : > { %2573 = vpow2.f32 %v1554_v27 }
 0x1dd   : > { %2575 = vpow2.f32 %v1556_v32 }
 0x1de   : > { %v3199_v28 = vpop.eup %2557  ;;  %2577 = vpow2.f32 %v1558_v42 }
 0x1df   : > { %v3201_v29 = vpop.eup %2559  ;;  %v1570_v37 = vsel %vm1484_vm6, %v3199_v28, 0.0  ;;  %2579 = vpow2.f32 %v1560_v46 }
 0x1e0   : > { %v3207_v39 = vpop.eup %2561  ;;  %v1571_v6 = vsel %vm1484_vm6, %v3201_v29, 0.0  ;;  %2581 = vpow2.f32 %v1562_v51 }
 0x1e1   : > { %v3211_v22 = vpop.eup %2563  ;;  %v1572_v43 = vadd.f32 %v1571_v6, %v1570_v37  ;;  %v1573_v24 = vsel %vm1484_vm6, %v3207_v39, 0.0  ;;  %2583 = vpow2.f32 %v1564_v62 }
 0x1e2   : > { %v3217_v44 = vpop.eup %2565  ;;  %v1575_v48 = vsel %vm1484_vm6, %v3211_v22, 0.0  ;;  %2585 = vpow2.f32 %v1566_v5 }
 0x1e3   : > { %v1574_v47 = vadd.f32 %v1573_v24, %v1572_v43  ;;  %v3223_v49 = vpop.eup %2567  ;;  %v1577_v56 = vsel %vm1484_vm6, %v3217_v44, 0.0  ;;  %2587 = vpow2.f32 %v1568_v11 }
 0x1e4   : > { %v3229_v57 = vpop.eup %2569  ;;  %v1579_v2 = vsel %vm1484_vm6, %v3223_v49, 0.0 }
 0x1e5   : > { %v1576_v55 = vadd.f32 %v1575_v48, %v1574_v47  ;;  %v3235_v3 = vpop.eup %2571  ;;  %v1581_v8 = vsel %vm1484_vm6, %v3229_v57, 0.0 }
 0x1e6   : > { %v3239_v10 = vpop.eup %2573  ;;  %v1583_v61 = vsel %vm1484_vm6, %v3235_v3, 0.0 }
 0x1e7   : > { %v1578_v0 = vadd.f32 %v1577_v56, %v1576_v55  ;;  %v3243_v13 = vpop.eup %2575  ;;  %v1585_v15 = vsel %vm1484_vm6, %v3239_v10, 0.0 }
 0x1e8   : > { %v3247_v17 = vpop.eup %2577  ;;  %v1587_v23 = vsel %vm1484_vm6, %v3243_v13, 0.0 }
 0x1e9   : > { %v1580_v7 = vadd.f32 %v1579_v2, %v1578_v0  ;;  %v3251_v25 = vpop.eup %2579  ;;  %v1589_v27 = vsel %vm1484_vm6, %v3247_v17, 0.0 }
 0x1ea   : > { %v3255_v30 = vpop.eup %2581  ;;  %v1591_v37 = vsel %vm1484_vm6, %v3251_v25, 0.0 }
 0x1eb   : > { %v1582_v12 = vadd.f32 %v1581_v8, %v1580_v7  ;;  %v3259_v6 = vpop.eup %2583  ;;  %v1593_v42 = vsel %vm1484_vm6, %v3255_v30, 0.0 }
 0x1ec   : > { %v3263_v43 = vpop.eup %2585  ;;  %v1595_v45 = vsel %vm1484_vm6, %v3259_v6, 0.0 }
 0x1ed   : > { %v1584_v14 = vadd.f32 %v1583_v61, %v1582_v12  ;;  %v3267_v46 = vpop.eup %2587  ;;  %v1597_v48 = vsel %vm1484_vm6, %v3263_v43, 0.0 }
 0x1ee   : > { %v1599_v51 = vsel %vm1484_vm6, %v3267_v46, 0.0 }
 0x1ef   : > { %v1586_v21 = vadd.f32 %v1585_v15, %v1584_v14 }
 0x1f1   : > { %v1588_v26 = vadd.f32 %v1587_v23, %v1586_v21 }
 0x1f3   : > { %v1590_v32 = vadd.f32 %v1589_v27, %v1588_v26 }
 0x1f5   : > { %v1592_v41 = vadd.f32 %v1591_v37, %v1590_v32 }
 0x1f7   : > { %v1594_v24 = vadd.f32 %v1593_v42, %v1592_v41 }
 0x1f9   : > { %v1596_v47 = vadd.f32 %v1595_v45, %v1594_v24 }
 0x1fb   : > { %v1598_v50 = vadd.f32 %v1597_v48, %v1596_v47 }
 0x1fd   : > { %v1600_v55 = vadd.f32 %v1599_v51, %v1598_v50 }
 0x1ff   : > { %v1601_v56 = vrot.slane %v1600_v55, 4 }
 0x201   : > { %v1602_v62 = vadd.f32 %v1601_v56, %v1600_v55 }
 0x203   : > { %v1603_v63 = vrot.slane %v1602_v62, 2 }
 0x205   : > { %v1604_v0 = vadd.f32 %v1603_v63, %v1602_v62 }
 0x207   : > { %v1605_v2 = vrot.slane %v1604_v0, 1 }
 0x209   : > { %v1606_v5 = vadd.f32 %v1605_v2, %v1604_v0 }
 0x20b   : > { %v1607_v7 = vadd.f32 1e-10, %v1606_v5 }
 0x20d   : > { %2589 = vrcp.f32 %v1607_v7 }
 0x217   : > { %v3273_v8 = vpop.eup %2589 }
 0x218   : > { %v3277_v11 = vmul.f32 %v3273_v8, %v3199_v28  ;;  %v3281_v12 = vmul.f32 %v3273_v8, %v3201_v29 }
 0x23d   : > { %v792_v14 = vpop.xlane.xlu1 %791 }
 0x23e   : > { %v836_v15 = vsub.f32 %v3055_v33, %v792_v14  ;;  %v789_v21 = vpop.xlane.xlu0 %788 }
 0x23f   : > { %v835_v23 = vsub.f32 %v3058_v34, %v789_v21 }
 0x240   : > { %v853_v26 = vmul.f32 1.442695, %v836_v15 }
 0x241   : > { %v851_v27 = vmul.f32 1.442695, %v835_v23  ;;  %v795_v32 = vpop.xlane.xlu1 %794 }
 0x242   : > { %2591 = vpow2.f32 %v853_v26  ;;  %v837_v28 = vsub.f32 %v3061_v35, %v795_v32  ;;  %v798_v37 = vpop.xlane.xlu0 %797 }
 0x243   : > { %2593 = vpow2.f32 %v851_v27  ;;  %v838_v29 = vsub.f32 %v3069_v38, %v798_v37 }
 0x244   : > { %v855_v41 = vmul.f32 1.442695, %v837_v28 }
 0x245   : > { %v801_v42 = vpop.xlane.xlu1 %800  ;;  %v857_v24 = vmul.f32 1.442695, %v838_v29 }
 0x246   : > { %2595 = vpow2.f32 %v855_v41  ;;  %v839_v45 = vsub.f32 %v3064_v36, %v801_v42  ;;  %v804_v47 = vpop.xlane.xlu0 %803 }
 0x247   : > { %v840_v48 = vsub.f32 %v3093_v52, %v804_v47  ;;  %2597 = vpow2.f32 %v857_v24 }
 0x248   : > { %v859_v55 = vmul.f32 1.442695, %v839_v45 }
 0x249   : > { %v861_v50 = vmul.f32 1.442695, %v840_v48  ;;  %v807_v51 = vpop.xlane.xlu1 %806 }
 0x24a   : > { %v841_v56 = vsub.f32 %v3096_v53, %v807_v51  ;;  %v810_v62 = vpop.xlane.xlu0 %809 }
 0x24b   : > { %2599 = vpow2.f32 %v861_v50  ;;  %v842_v63 = vsub.f32 %v3099_v54, %v810_v62 }
 0x24c   : > { %v3293_v0 = vpop.eup %2591  ;;  %2601 = vpow2.f32 %v859_v55  ;;  %v863_v14 = vmul.f32 1.442695, %v841_v56 }
 0x24d   : > { %v3295_v2 = vpop.eup %2593  ;;  %v865_v5 = vmul.f32 1.442695, %v842_v63  ;;  %v813_v7 = vpop.xlane.xlu1 %812  ;;  %901 = vrot.lane.b32.xlu0 %v3293_v0, %s2784_s29 }
 0x24e   : > { %v843_v15 = vsub.f32 %v3105_v58, %v813_v7  ;;  %899 = vrot.lane.b32.xlu1 %v3295_v2, %s2784_s29  ;;  %v816_v21 = vpop.xlane.xlu0 %815 }
 0x24f   : > { %2603 = vpow2.f32 %v865_v5  ;;  %v844_v23 = vsub.f32 %v3108_v59, %v816_v21 }
 0x250   : > { %v3303_v26 = vpop.eup %2595  ;;  %2605 = vpow2.f32 %v863_v14  ;;  %v867_v28 = vmul.f32 1.442695, %v843_v15 }
 0x251   : > { %v869_v27 = vmul.f32 1.442695, %v844_v23  ;;  %v819_v32 = vpop.xlane.xlu1 %818  ;;  %v3309_v42 = vpop.eup %2597 }
 0x252   : > { %v845_v37 = vsub.f32 %v3124_v4, %v819_v32  ;;  %903 = vrot.lane.b32.xlu1 %v3303_v26, %s2784_s29  ;;  %v822_v29 = vpop.xlane.xlu0 %821 }
 0x253   : > { %2607 = vpow2.f32 %v869_v27  ;;  %v846_v41 = vsub.f32 %v3140_v16, %v822_v29 }
 0x254   : > { %2609 = vpow2.f32 %v867_v28  ;;  %v871_v48 = vmul.f32 1.442695, %v845_v37 }
 0x255   : > { %v3311_v24 = vpop.eup %2599  ;;  %v873_v45 = vmul.f32 1.442695, %v846_v41  ;;  %v825_v47 = vpop.xlane.xlu1 %824 }
 0x256   : > { %v847_v50 = vsub.f32 %v3074_v40, %v825_v47  ;;  %905 = vrot.lane.b32.xlu1 %v3309_v42, %s2784_s29  ;;  %909 = vrot.lane.b32.xlu0 %v3311_v24, %s2784_s29  ;;  %v828_v51 = vpop.xlane.xlu0 %827  ;;  %v3319_v56 = vpop.eup %2601 }
 0x257   : > { %2611 = vpow2.f32 %v873_v45  ;;  %v848_v55 = vsub.f32 %v3111_v60, %v828_v51 }
 0x258   : > { %2613 = vpow2.f32 %v871_v48  ;;  %v875_v7 = vmul.f32 1.442695, %v847_v50 }
 0x259   : > { %v3321_v62 = vpop.eup %2603  ;;  %v877_v63 = vmul.f32 1.442695, %v848_v55  ;;  %v831_v5 = vpop.xlane.xlu1 %830 }
 0x25a   : > { %907 = vrot.lane.b32.xlu1 %v3319_v56, %s2784_s29  ;;  %913 = vrot.lane.b32.xlu0 %v3321_v62, %s2784_s29  ;;  %v834_v14 = vpop.xlane.xlu0 %833  ;;  %v849_v15 = vsub.f32 %v3153_v31, %v831_v5  ;;  %v3329_v23 = vpop.eup %2605 }
 0x25b   : > { %2615 = vpow2.f32 %v877_v63  ;;  %v850_v21 = vsub.f32 %v3131_v9, %v834_v14 }
 0x25c   : > { %2617 = vpow2.f32 %v875_v7  ;;  %v879_v28 = vmul.f32 1.442695, %v849_v15 }
 0x25d   : > { %v3331_v27 = vpop.eup %2607  ;;  %v881_v32 = vmul.f32 1.442695, %v850_v21 }
 0x25e   : > { %911 = vrot.lane.b32.xlu1 %v3329_v23, %s2784_s29  ;;  %917 = vrot.lane.b32.xlu0 %v3331_v27, %s2784_s29  ;;  %v3337_v37 = vpop.eup %2609 }
 0x25f   : > { %2619 = vpow2.f32 %v881_v32 }
 0x260   : > { %2621 = vpow2.f32 %v879_v28 }
 0x261   : > { %v3339_v29 = vpop.eup %2611 }
 0x262   : > { %915 = vrot.lane.b32.xlu1 %v3337_v37, %s2784_s29  ;;  %921 = vrot.lane.b32.xlu0 %v3339_v29, %s2784_s29  ;;  %v3345_v41 = vpop.eup %2613 }
 0x265   : > { %v3347_v45 = vpop.eup %2615 }
 0x266   : > { %919 = vrot.lane.b32.xlu1 %v3345_v41, %s2784_s29  ;;  %925 = vrot.lane.b32.xlu0 %v3347_v45, %s2784_s29  ;;  %v3353_v47 = vpop.eup %2617 }
 0x269   : > { %v3355_v48 = vpop.eup %2619 }
 0x26a   : > { %923 = vrot.lane.b32.xlu1 %v3353_v47, %s2784_s29  ;;  %929 = vrot.lane.b32.xlu0 %v3355_v48, %s2784_s29  ;;  %v3361_v50 = vpop.eup %2621 }
 0x26e   : > { %927 = vrot.lane.b32.xlu1 %v3361_v50, %s2784_s29 }
 0x2bf   : > { %v902_v51 = vpop.permute.xlu0 %901 }
 0x2c0   : > { %v900_v55 = vpop.permute.xlu1 %899  ;;  %v951_v63 = vsel %vm947_vm7, %v902_v51, 0.0 }
 0x2c1   : > { %v948_v5 = vsel %vm947_vm7, %v900_v55, 0.0  ;;  %952 = vadd.xlane.f32.xlu0 %v951_v63 }
 0x2c2   : > { %949 = vadd.xlane.f32.xlu1 %v948_v5 }
 0x2c4   : > { %v904_v7 = vpop.permute.xlu1 %903 }
 0x2c5   : > { %v954_v14 = vsel %vm947_vm7, %v904_v7, 0.0 }
 0x2c6   : > { %955 = vadd.xlane.f32.xlu0 %v954_v14 }
 0x2c8   : > { %v906_v15 = vpop.permute.xlu1 %905  ;;  %v910_v21 = vpop.permute.xlu0 %909 }
 0x2c9   : > { %v957_v32 = vsel %vm947_vm7, %v906_v15, 0.0  ;;  %v963_v19 = vsel %vm947_vm7, %v910_v21, 0.0 }
 0x2ca   : > { %958 = vadd.xlane.f32.xlu0 %v957_v32 }
 0x2cc   : > { %v908_v28 = vpop.permute.xlu1 %907  ;;  %v914_v18 = vpop.permute.xlu0 %913 }
 0x2cd   : > { %v960_v61 = vsel %vm947_vm7, %v908_v28, 0.0  ;;  %v969_v5 = vsel %vm947_vm7, %v914_v18, 0.0 }
 0x2ce   : > { %961 = vadd.xlane.f32.xlu1 %v960_v61  ;;  %964 = vadd.xlane.f32.xlu0 %v963_v19 }
 0x2d0   : > { %v912_v51 = vpop.permute.xlu1 %911  ;;  %v918_v55 = vpop.permute.xlu0 %917 }
 0x2d1   : > { %v966_v63 = vsel %vm947_vm7, %v912_v51, 0.0  ;;  %v975_v32 = vsel %vm947_vm7, %v918_v55, 0.0 }
 0x2d2   : > { %967 = vadd.xlane.f32.xlu1 %v966_v63  ;;  %970 = vadd.xlane.f32.xlu0 %v969_v5 }
 0x2d4   : > { %v916_v7 = vpop.permute.xlu1 %915  ;;  %v922_v14 = vpop.permute.xlu0 %921 }
 0x2d5   : > { %v972_v15 = vsel %vm947_vm7, %v916_v7, 0.0  ;;  %v981_v61 = vsel %vm947_vm7, %v922_v14, 0.0  ;;  %v1108_v14 = vld [vmem:[%s3742_s5] sm:$0xff] }
 0x2d6   : > { %973 = vadd.xlane.f32.xlu1 %v972_v15  ;;  %976 = vadd.xlane.f32.xlu0 %v975_v32 }
 0x2d7   : > { %2280 = vmatprep.subr.mxu0 %v1108_v14 }
 0x2d8   : > { %v920_v28 = vpop.permute.xlu1 %919  ;;  %v926_v21 = vpop.permute.xlu0 %925  ;;  %2281 = vmatpush3.msra.mxu0 %v1108_v14 }
 0x2d9   : > { %v978_v19 = vsel %vm947_vm7, %v920_v28, 0.0  ;;  %v987_v63 = vsel %vm947_vm7, %v926_v21, 0.0 }
 0x2da   : > { %979 = vadd.xlane.f32.xlu1 %v978_v19  ;;  %982 = vadd.xlane.f32.xlu0 %v981_v61 }
 0x2dc   : > { %v924_v51 = vpop.permute.xlu1 %923  ;;  %v930_v5 = vpop.permute.xlu0 %929 }
 0x2dd   : > { %v984_v18 = vsel %vm947_vm7, %v924_v51, 0.0  ;;  %v993_v15 = vsel %vm947_vm7, %v930_v5, 0.0 }
 0x2de   : > { %985 = vadd.xlane.f32.xlu1 %v984_v18  ;;  %988 = vadd.xlane.f32.xlu0 %v987_v63 }
 0x2e0   : > { %v928_v7 = vpop.permute.xlu1 %927 }
 0x2e1   : > { %v990_v55 = vsel %vm947_vm7, %v928_v7, 0.0 }
 0x2e2   : > { %991 = vadd.xlane.f32.xlu1 %v990_v55  ;;  %994 = vadd.xlane.f32.xlu0 %v993_v15 }
 0x34e   : > { %v953_v32 = vpop.xlane.xlu0 %952 }
 0x34f   : > { %v950_v28 = vpop.xlane.xlu1 %949  ;;  %2623 = vrcp.f32 %v953_v32 }
 0x350   : > { %2625 = vrcp.f32 %v950_v28 }
 0x353   : > { %v956_v21 = vpop.xlane.xlu0 %955 }
 0x354   : > { %2627 = vrcp.f32 %v956_v21 }
 0x357   : > { %v959_v19 = vpop.xlane.xlu0 %958 }
 0x358   : > { %2629 = vrcp.f32 %v959_v19 }
 0x359   : > { %v2624_v61 = vpop.eup %2623 }
 0x35a   : > { %v2626_v51 = vpop.eup %2625  ;;  %v999_v18 = vmul.f32 %v2624_v61, %v3293_v0 }
 0x35b   : > { %v962_v63 = vpop.xlane.xlu1 %961  ;;  %v965_v5 = vpop.xlane.xlu0 %964  ;;  %v997_v7 = vmul.f32 %v2626_v51, %v3295_v2 }
 0x35c   : > { %2631 = vrcp.f32 %v962_v63  ;;  %1046 = vrot.lane.b32.xlu0 %v999_v18, %s2784_s29 }
 0x35d   : > { %2633 = vrcp.f32 %v965_v5  ;;  %1044 = vrot.lane.b32.xlu1 %v997_v7, %s2784_s29 }
 0x35e   : > { %v2628_v55 = vpop.eup %2627 }
 0x35f   : > { %v968_v15 = vpop.xlane.xlu1 %967  ;;  %v971_v14 = vpop.xlane.xlu0 %970  ;;  %v1001_v32 = vmul.f32 %v2628_v55, %v3303_v26 }
 0x360   : > { %2635 = vrcp.f32 %v968_v15 }
 0x361   : > { %2637 = vrcp.f32 %v971_v14  ;;  %1048 = vrot.lane.b32.xlu1 %v1001_v32, %s2784_s29 }
 0x362   : > { %v2630_v0 = vpop.eup %2629 }
 0x363   : > { %v974_v28 = vpop.xlane.xlu1 %973  ;;  %v977_v21 = vpop.xlane.xlu0 %976  ;;  %v1003_v2 = vmul.f32 %v2630_v0, %v3309_v42 }
 0x364   : > { %2639 = vrcp.f32 %v974_v28 }
 0x365   : > { %2641 = vrcp.f32 %v977_v21  ;;  %1050 = vrot.lane.b32.xlu1 %v1003_v2, %s2784_s29 }
 0x366   : > { %v2632_v19 = vpop.eup %2631 }
 0x367   : > { %v2634_v61 = vpop.eup %2633  ;;  %v980_v51 = vpop.xlane.xlu1 %979  ;;  %v1005_v63 = vmul.f32 %v2632_v19, %v3319_v56 }
 0x368   : > { %v983_v18 = vpop.xlane.xlu0 %982  ;;  %2643 = vrcp.f32 %v980_v51  ;;  %v1007_v26 = vmul.f32 %v2634_v61, %v3311_v24 }
 0x369   : > { %2645 = vrcp.f32 %v983_v18  ;;  %1052 = vrot.lane.b32.xlu1 %v1005_v63, %s2784_s29 }
 0x36a   : > { %v2636_v5 = vpop.eup %2635  ;;  %1054 = vrot.lane.b32.xlu0 %v1007_v26, %s2784_s29  ;;  %v1611_v26 = vmul.f32 %v3273_v8, %v3207_v39  ;;  %v1616_v39 = vmul.f32 %v3273_v8, %v3235_v3  ;;  %v1620_v3 = vmul.f32 %v3273_v8, %v3251_v25 }
 0x36b   : > { %v2638_v42 = vpop.eup %2637  ;;  %v986_v7 = vpop.xlane.xlu1 %985  ;;  %v1009_v15 = vmul.f32 %v2636_v5, %v3329_v23  ;;  %v1612_v5 = vmul.f32 %v3273_v8, %v3211_v22  ;;  %v3767_v22 = vpack.i.bf16 %v3281_v12, %v3277_v11  ;;  %v1621_v11 = vmul.f32 %v3273_v8, %v3255_v30 }
 0x36c   : > { %v989_v55 = vpop.xlane.xlu0 %988  ;;  %2647 = vrcp.f32 %v986_v7  ;;  %v1011_v14 = vmul.f32 %v2638_v42, %v3321_v62  ;;  %v1622_v12 = vmul.f32 %v3273_v8, %v3259_v6  ;;  %v2514_v30 = vpack.i.bf16 %v3069_v38, %v3061_v35 }
 0x36d   : > { %2649 = vrcp.f32 %v989_v55  ;;  %1056 = vrot.lane.b32.xlu1 %v1009_v15, %s2784_s29  ;;  %v2474_v42 = vpack.i.bf16 %v1612_v5, %v1611_v26  ;;  %v1624_v15 = vmul.f32 %v3273_v8, %v3267_v46  ;;  %v2519_v6 = vpack.i.bf16 %v3093_v52, %v3064_v36 }
 0x36e   : > { %v2640_v56 = vpop.eup %2639  ;;  %1058 = vrot.lane.b32.xlu0 %v1011_v14, %s2784_s29  ;;  %v2509_v14 = vpack.i.bf16 %v3055_v33, %v3058_v34  ;;  %v2529_v46 = vpack.i.bf16 %v3108_v59, %v3105_v58 }
 0x36f   : > { %v2642_v24 = vpop.eup %2641  ;;  %v992_v32 = vpop.xlane.xlu1 %991  ;;  %v1013_v28 = vmul.f32 %v2640_v56, %v3337_v37  ;;  %v2539_v56 = vpack.i.bf16 %v3111_v60, %v3074_v40 }
 0x370   : > { %v995_v0 = vpop.xlane.xlu0 %994  ;;  %2651 = vrcp.f32 %v992_v32  ;;  %v1015_v21 = vmul.f32 %v2642_v24, %v3331_v27  ;;  %v2544_v24 = vpack.i.bf16 %v3131_v9, %v3153_v31  ;;  %v484_v32 = vmul.f32 %v3023_v1, %v3023_v1 }
 0x371   : > { %2653 = vrcp.f32 %v995_v0  ;;  %1060 = vrot.lane.b32.xlu1 %v1013_v28, %s2784_s29 }
 0x372   : > { %v2644_v23 = vpop.eup %2643  ;;  %1062 = vrot.lane.b32.xlu0 %v1015_v21, %s2784_s29  ;;  %v485_v0 = vsel %vm469_vm0, %v484_v32, 0.0 }
 0x373   : > { %v2646_v62 = vpop.eup %2645  ;;  %v1017_v2 = vmul.f32 %v2644_v23, %v3345_v41 }
 0x374   : > { %v1019_v19 = vmul.f32 %v2646_v62, %v3339_v29 }
 0x375   : > { %1064 = vrot.lane.b32.xlu1 %v1017_v2, %s2784_s29 }
 0x376   : > { %v2648_v61 = vpop.eup %2647  ;;  %1066 = vrot.lane.b32.xlu0 %v1019_v19, %s2784_s29 }
 0x377   : > { %v2650_v37 = vpop.eup %2649  ;;  %v1021_v51 = vmul.f32 %v2648_v61, %v3353_v47  ;;  %v1614_v47 = vmul.f32 %v3273_v8, %v3223_v49  ;;  %v1618_v49 = vmul.f32 %v3273_v8, %v3243_v13  ;;  %v1623_v13 = vmul.f32 %v3273_v8, %v3263_v43 }
 0x378   : > { %v1023_v27 = vmul.f32 %v2650_v37, %v3347_v45  ;;  %v1613_v45 = vmul.f32 %v3273_v8, %v3217_v44  ;;  %v1617_v44 = vmul.f32 %v3273_v8, %v3239_v10  ;;  %v2524_v43 = vpack.i.bf16 %v3099_v54, %v3096_v53 }
 0x379   : > { %1068 = vrot.lane.b32.xlu1 %v1021_v51, %s2784_s29  ;;  %v2504_v25 = vpack.i.bf16 %v1624_v15, %v1623_v13 }
 0x37a   : > { %v2652_v18 = vpop.eup %2651  ;;  %1070 = vrot.lane.b32.xlu0 %v1023_v27, %s2784_s29  ;;  %v2489_v55 = vpack.i.bf16 %v1618_v49, %v1617_v44 }
 0x37b   : > { %v2654_v63 = vpop.eup %2653  ;;  %v1025_v41 = vmul.f32 %v2652_v18, %v3361_v50  ;;  %v2479_v50 = vpack.i.bf16 %v1614_v47, %v1613_v45 }
 0x37c   : > { %v1027_v29 = vmul.f32 %v2654_v63, %v3355_v48  ;;  %v1615_v48 = vmul.f32 %v3273_v8, %v3229_v57  ;;  %v1619_v57 = vmul.f32 %v3273_v8, %v3247_v17  ;;  %v2499_v17 = vpack.i.bf16 %v1622_v12, %v1621_v11 }
 0x37d   : > { %1072 = vrot.lane.b32.xlu1 %v1025_v41, %s2784_s29  ;;  %v2534_v8 = vpack.i.bf16 %v3140_v16, %v3124_v4 }
 0x37e   : > { %1074 = vrot.lane.b32.xlu0 %v1027_v29, %s2784_s29  ;;  %v2484_v7 = vpack.i.bf16 %v1616_v39, %v1615_v48  ;;  %v2494_v10 = vpack.i.bf16 %v1620_v3, %v1619_v57  ;;  %s3471_s29 = scalar_lea.vmem %s3746_s9, %s2153_s26  ;;  %s433_s26 = scalar_lea.vmem [#allocation4], %s3020_s28 }
 0x37f   : > { %s1917_s20 = sshll.u32 %s433_s26, 4  ;;  %s3625_s20 = int_to_ptr.vmem [resolvable:$true] %s1917_s20 }
 0x380   : > { %s2657_s3 = scalar_lea.vmem %s3625_s20, 16 }
 0x381   : > { %2470 = vrot.lane.b32.xlu1 %v3767_v22, %s2785_s18  ;;  %p2658_p11 = scmp.ne.s32.totalorder %s3625_s20, %s2657_s3 }
 0x382   : > { %2475 = vrot.lane.b32.xlu0 %v2474_v42, %s2785_s18 }
 0x383   : > { %p2659_p12 = pnand %p2658_p11, %p2896_p5 }
 0x385   : > { %2480 = vrot.lane.b32.xlu1 %v2479_v50, %s2785_s18  ;;  %p2660_p13 = pneg %p2659_p12 }
 0x386   : > { %2485 = vrot.lane.b32.xlu0 %v2484_v7, %s2785_s18 }
 0x389   : > { %2490 = vrot.lane.b32.xlu1 %v2489_v55, %s2785_s18 }
 0x38a   : > { %2495 = vrot.lane.b32.xlu0 %v2494_v10, %s2785_s18 }
 0x38d   : > { %2500 = vrot.lane.b32.xlu1 %v2499_v17, %s2785_s18 }
 0x38e   : > { %2505 = vrot.lane.b32.xlu0 %v2504_v25, %s2785_s18  ;;  %s2787_s18 = smov [#allocation4]  }
 0x391   : > { %2510 = vrot.lane.b32.xlu1 %v2509_v14, %s2786_s19 }
 0x392   : > { %2515 = vrot.lane.b32.xlu0 %v2514_v30, %s2786_s19 }
 0x395   : > { %2520 = vrot.lane.b32.xlu1 %v2519_v6, %s2786_s19 }
 0x396   : > { %2525 = vrot.lane.b32.xlu0 %v2524_v43, %s2786_s19 }
 0x399   : > { %2530 = vrot.lane.b32.xlu1 %v2529_v46, %s2786_s19 }
 0x39a   : > { %2535 = vrot.lane.b32.xlu0 %v2534_v8, %s2786_s19 }
 0x39d   : > { %2540 = vrot.lane.b32.xlu1 %v2539_v56, %s2786_s19 }
 0x39e   : > { %2545 = vrot.lane.b32.xlu0 %v2544_v24, %s2786_s19  ;;  %s2661_s19 = sshll.u32 %s2787_s18, 4  ;;  %s2662_s19 = int_to_ptr.vmem [resolvable:$false] %s2661_s19 }
 0x39f   : > { %p2664_p0 = scmp.lt.s32.totalorder %s3625_s20, %s2662_s19 }
 0x3bd   : > { %486 = vadd.xlane.f32.xlu0 %v485_v0 }
 0x3ce   : > { %v1047_v28 = vpop.permute.xlu0 %1046 }
 0x3cf   : > { %v1045_v21 = vpop.permute.xlu1 %1044  ;;  %1093 = vst.msk [vmem:[%s3471_s29 + $0x8] sm:$0xff] %vm947_vm7, %v1047_v28 }
 0x3d0   : > { %1092 = vst.msk [vmem:[%s3471_s29] sm:$0xff] %vm947_vm7, %v1045_v21  ;;  %2282 = vmatprep.mubr.msk.f32.mxu0 %vm947_vm7, %v1045_v21 }
 0x3d1   : > { %2283 = vmatmul.mubr.msk.f32.vlgmr.msra.gmra.mrb[2].mxu0 %vm947_vm7, %v1047_v28 }
 0x3d3   : > { %v1049_v1 = vpop.permute.xlu1 %1048 }
 0x3d4   : > { %1094 = vst.msk [vmem:[%s3471_s29 + $0x10] sm:$0xff] %vm947_vm7, %v1049_v1  ;;  %2285 = vmatprep.mubr.msk.f32.mxu0 %vm947_vm7, %v1049_v1 }
 0x3d7   : > { %v1051_v23 = vpop.permute.xlu1 %1050 }
 0x3d8   : > { %1095 = vst.msk [vmem:[%s3471_s29 + $0x18] sm:$0xff] %vm947_vm7, %v1051_v23  ;;  %2286 = vmatmul.mubr.msk.f32.gmra.mrb[4].mxu0 %vm947_vm7, %v1051_v23 }
 0x3db   : > { %v1053_v62 = vpop.permute.xlu1 %1052 }
 0x3dc   : > { %1096 = vst.msk [vmem:[%s3471_s29 + $0x20] sm:$0xff] %vm947_vm7, %v1053_v62  ;;  %v1055_v2 = vpop.permute.xlu0 %1054  ;;  %2288 = vmatprep.mubr.msk.f32.mxu0 %vm947_vm7, %v1053_v62 }
 0x3dd   : > { %1097 = vst.msk [vmem:[%s3471_s29 + $0x28] sm:$0xff] %vm947_vm7, %v1055_v2  ;;  %2289 = vmatmul.mubr.msk.f32.gmra.mrb[6].mxu0 %vm947_vm7, %v1055_v2 }
 0x3df   : > { %v1057_v19 = vpop.permute.xlu1 %1056 }
 0x3e0   : > { %1098 = vst.msk [vmem:[%s3471_s29 + $0x30] sm:$0xff] %vm947_vm7, %v1057_v19  ;;  %v1059_v61 = vpop.permute.xlu0 %1058  ;;  %2291 = vmatprep.mubr.msk.f32.mxu0 %vm947_vm7, %v1057_v19 }
 0x3e1   : > { %1099 = vst.msk [vmem:[%s3471_s29 + $0x38] sm:$0xff] %vm947_vm7, %v1059_v61  ;;  %2292 = vmatmul.mubr.msk.f32.gmra.mrb[8].mxu0 %vm947_vm7, %v1059_v61 }
 0x3e3   : > { %v1061_v37 = vpop.permute.xlu1 %1060 }
 0x3e4   : > { %1100 = vst.msk [vmem:[%s3471_s29 + $0x40] sm:$0xff] %vm947_vm7, %v1061_v37  ;;  %v1063_v51 = vpop.permute.xlu0 %1062  ;;  %2294 = vmatprep.mubr.msk.f32.mxu0 %vm947_vm7, %v1061_v37 }
 0x3e5   : > { %1101 = vst.msk [vmem:[%s3471_s29 + $0x48] sm:$0xff] %vm947_vm7, %v1063_v51  ;;  %2295 = vmatmul.mubr.msk.f32.gmra.mrb[10].mxu0 %vm947_vm7, %v1063_v51 }
 0x3e7   : > { %v1065_v27 = vpop.permute.xlu1 %1064 }
 0x3e8   : > { %1102 = vst.msk [vmem:[%s3471_s29 + $0x50] sm:$0xff] %vm947_vm7, %v1065_v27  ;;  %v1067_v18 = vpop.permute.xlu0 %1066  ;;  %2297 = vmatprep.mubr.msk.f32.mxu0 %vm947_vm7, %v1065_v27 }
 0x3e9   : > { %1103 = vst.msk [vmem:[%s3471_s29 + $0x58] sm:$0xff] %vm947_vm7, %v1067_v18  ;;  %2298 = vmatmul.mubr.msk.f32.gmra.mrb[12].mxu0 %vm947_vm7, %v1067_v18 }
 0x3eb   : > { %v1069_v63 = vpop.permute.xlu1 %1068 }
 0x3ec   : > { %1104 = vst.msk [vmem:[%s3471_s29 + $0x60] sm:$0xff] %vm947_vm7, %v1069_v63  ;;  %v1071_v41 = vpop.permute.xlu0 %1070  ;;  %2300 = vmatprep.mubr.msk.f32.mxu0 %vm947_vm7, %v1069_v63 }
 0x3ed   : > { %1105 = vst.msk [vmem:[%s3471_s29 + $0x68] sm:$0xff] %vm947_vm7, %v1071_v41  ;;  %2301 = vmatmul.mubr.msk.f32.gmra.mrb[14].mxu0 %vm947_vm7, %v1071_v41 }
 0x3ef   : > { %v1073_v29 = vpop.permute.xlu1 %1072 }
 0x3f0   : > { %1106 = vst.msk [vmem:[%s3471_s29 + $0x70] sm:$0xff] %vm947_vm7, %v1073_v29  ;;  %v1075_v26 = vpop.permute.xlu0 %1074  ;;  %2303 = vmatprep.mubr.msk.f32.mxu0 %vm947_vm7, %v1073_v29 }
 0x3f1   : > { %1107 = vst.msk [vmem:[%s3471_s29 + $0x78] sm:$0xff] %vm947_vm7, %v1075_v26  ;;  %2304 = vmatmul.mubr.msk.f32.gmra.mrb[16].mxu0 %vm947_vm7, %v1075_v26 }
 0x3f3   : > { %v2471_v5 = vpop.permute.xlu1 %2470 }
 0x3f4   : > { %v2476_v45 = vpop.permute.xlu0 %2475  ;;  %v2472_v47 = vunpack.i.l.bf16 %v2471_v5  ;;  %v2473_v48 = vunpack.i.h.bf16 %v2471_v5 }
 0x3f5   : > { %v2477_v50 = vunpack.i.l.bf16 %v2476_v45  ;;  %v2478_v7 = vunpack.i.h.bf16 %v2476_v45 }
 0x3f6   : > { %1689 = vxpose.xlu1.b32.start [1/16] (narrow) %v2472_v47, 16 }
 0x3f7   : > { %v2481_v42 = vpop.permute.xlu1 %2480 }
 0x3f8   : > { %v2486_v39 = vpop.permute.xlu0 %2485  ;;  %v2482_v55 = vunpack.i.l.bf16 %v2481_v42  ;;  %v2483_v14 = vunpack.i.h.bf16 %v2481_v42 }
 0x3f9   : > { %v2487_v8 = vunpack.i.l.bf16 %v2486_v39  ;;  %v2488_v28 = vunpack.i.h.bf16 %v2486_v39 }
 0x3fa   : > { %1690 = vxpose.xlu1.b32.cont [2/16] (narrow) %v2473_v48, 16 }
 0x3fb   : > { %v2491_v22 = vpop.permute.xlu1 %2490 }
 0x3fc   : > { %v3521_v44 = vpop.permute.xlu0 %2495  ;;  %v2492_v2 = vunpack.i.l.bf16 %v2491_v22  ;;  %v2493_v27 = vunpack.i.h.bf16 %v2491_v22 }
 0x3fd   : > { %v2497_v26 = vunpack.i.l.bf16 %v3521_v44  ;;  %v2498_v42 = vunpack.i.h.bf16 %v3521_v44  ;;  %v1360_v44 = vld [vmem:[%s3743_s6 + $0x8] sm:$0xff] }
 0x3fe   : > { %1691 = vxpose.xlu1.b32.cont [3/16] (narrow) %v2477_v50, 16 }
 0x3ff   : > { %v3523_v49 = vpop.permute.xlu1 %2500 }
 0x400   : > { %v3525_v57 = vpop.permute.xlu0 %2505  ;;  %v2502_v39 = vunpack.i.l.bf16 %v3523_v49  ;;  %v2503_v22 = vunpack.i.h.bf16 %v3523_v49  ;;  %v1359_v49 = vld [vmem:[%s3743_s6] sm:$0xff] }
 0x401   : > { %v2507_v50 = vunpack.i.l.bf16 %v3525_v57 }
 0x402   : > { %1692 = vxpose.xlu1.b32.cont [4/16] (narrow) %v2478_v7, 16  ;;  %v2508_v7 = vunpack.i.h.bf16 %v3525_v57 }
 0x403   : > { %v2511_v3 = vpop.permute.xlu1 %2510 }
 0x404   : > { %v2513_v11 = vunpack.i.h.bf16 %v2511_v3  ;;  %v2512_v12 = vunpack.i.l.bf16 %v2511_v3  ;;  %v2516_v10 = vpop.permute.xlu0 %2515  ;;  %v1362_v3 = vld [vmem:[%s3743_s6 + $0x18] sm:$0xff] }
 0x405   : > { %v2518_v13 = vunpack.i.h.bf16 %v2516_v10  ;;  %v2517_v15 = vunpack.i.l.bf16 %v2516_v10  ;;  %v1366_v10 = vld [vmem:[%s3743_s6 + $0x38] sm:$0xff] }
 0x406   : > { %v2381_v17 = vpack.c.bf16 %v2513_v11, %v2512_v12  ;;  %1693 = vxpose.xlu1.b32.cont [5/16] (narrow) %v2482_v55, 16  ;;  %v2365_v55 = vpack.c.bf16 %v1362_v3, %v1360_v44  ;;  %v1361_v11 = vld [vmem:[%s3743_s6 + $0x10] sm:$0xff]  ;;  %v1364_v12 = vld [vmem:[%s3743_s6 + $0x28] sm:$0xff] }
 0x407   : > { %v2521_v25 = vpop.permute.xlu1 %2520  ;;  %v2385_v30 = vpack.c.bf16 %v2518_v13, %v2517_v15  ;;  %v2367_v57 = vpack.c.bf16 %v1361_v11, %v1359_v49  ;;  %v2369_v13 = vpack.c.bf16 %v1366_v10, %v1364_v12  ;;  %v1363_v15 = vld [vmem:[%s3743_s6 + $0x20] sm:$0xff] }
 0x408   : > { %v2523_v6 = vunpack.i.h.bf16 %v2521_v25  ;;  %v2522_v43 = vunpack.i.l.bf16 %v2521_v25  ;;  %2382 = vmatprep.subr.bf16.mxu0 %v2381_v17  ;;  %v2526_v46 = vpop.permute.xlu0 %2525  ;;  %2366 = vmatprep.subr.bf16.mxu1 %v2365_v55  ;;  %v1368_v25 = vld [vmem:[%s3743_s6 + $0x48] sm:$0xff] }
 0x409   : > { %2384 = vmatpush3.bf16.msra.mxu0 %v2381_v17  ;;  %v2528_v24 = vunpack.i.h.bf16 %v2526_v46  ;;  %v2527_v32 = vunpack.i.l.bf16 %v2526_v46  ;;  %2368 = vmatpush1.bf16.msra.mxu1 %v2367_v57  ;;  %v1365_v17 = vld [vmem:[%s3743_s6 + $0x30] sm:$0xff] }
 0x40a   : > { %2386 = vmatprep.subr.bf16.mxu0 %v2385_v30  ;;  %1694 = vxpose.xlu1.b32.cont [6/16] (narrow) %v2483_v14, 16  ;;  %v2389_v56 = vpack.c.bf16 %v2523_v6, %v2522_v43  ;;  %v2371_v14 = vpack.c.bf16 %v1365_v17, %v1363_v15  ;;  %v1367_v6 = vld [vmem:[%s3743_s6 + $0x40] sm:$0xff]  ;;  %v1369_v43 = vld [vmem:[%s3743_s6 + $0x50] sm:$0xff] }
 0x40b   : > { %v2531_v0 = vpop.permute.xlu1 %2530  ;;  %v2393_v21 = vpack.c.bf16 %v2528_v24, %v2527_v32  ;;  %2370 = vmatprep.subr.bf16.mxu1 %v2369_v13  ;;  %v2375_v24 = vpack.c.bf16 %v1369_v43, %v1367_v6 }
 0x40c   : > { %v2533_v1 = vunpack.i.h.bf16 %v2531_v0  ;;  %v2532_v23 = vunpack.i.l.bf16 %v2531_v0  ;;  %v2536_v62 = vpop.permute.xlu0 %2535  ;;  %v1371_v0 = vld [vmem:[%s3743_s6 + $0x60] sm:$0xff] }
 0x40d   : > { %2388 = vmatpush3.bf16.msra.mxu0 %v2385_v30  ;;  %v2538_v61 = vunpack.i.h.bf16 %v2536_v62  ;;  %v2537_v37 = vunpack.i.l.bf16 %v2536_v62  ;;  %v1370_v30 = vld [vmem:[%s3743_s6 + $0x58] sm:$0xff]  ;;  %2372 = vmatpush1.bf16.msra.mxu1 %v2371_v14 }
 0x40e   : > { %2390 = vmatprep.subr.bf16.mxu0 %v2389_v56  ;;  %1695 = vxpose.xlu1.b32.cont [7/16] (narrow) %v2487_v8, 16  ;;  %v2397_v19 = vpack.c.bf16 %v2533_v1, %v2532_v23  ;;  %v2373_v46 = vpack.c.bf16 %v1370_v30, %v1368_v25  ;;  %v1372_v8 = vld [vmem:[%s3743_s6 + $0x68] sm:$0xff] }
 0x40f   : > { %v2541_v51 = vpop.permute.xlu1 %2540  ;;  %v2401_v18 = vpack.c.bf16 %v2538_v61, %v2537_v37 }
 0x410   : > { %v2543_v63 = vunpack.i.h.bf16 %v2541_v51  ;;  %v2542_v41 = vunpack.i.l.bf16 %v2541_v51  ;;  %v2546_v29 = vpop.permute.xlu0 %2545  ;;  %2374 = vmatprep.subr.bf16.mxu1 %v2373_v46 }
 0x411   : > { %2392 = vmatpush3.bf16.msra.mxu0 %v2389_v56  ;;  %v2548_v45 = vunpack.i.h.bf16 %v2546_v29  ;;  %v2547_v47 = vunpack.i.l.bf16 %v2546_v29  ;;  %v1374_v56 = vld [vmem:[%s3743_s6 + $0x78] sm:$0xff]  ;;  %2376 = vmatpush1.bf16.msra.mxu1 %v2375_v24 }
 0x412   : > { %2394 = vmatprep.subr.bf16.mxu0 %v2393_v21  ;;  %1696 = vxpose.xlu1.b32.cont [8/16] (narrow) %v2488_v28, 16  ;;  %v2405_v5 = vpack.c.bf16 %v2543_v63, %v2542_v41  ;;  %v2377_v32 = vpack.c.bf16 %v1374_v56, %v1372_v8  ;;  %v1373_v28 = vld [vmem:[%s3743_s6 + $0x70] sm:$0xff] }
 0x413   : > { %v2409_v48 = vpack.c.bf16 %v2548_v45, %v2547_v47 }
 0x414   : > { %2378 = vmatprep.subr.bf16.mxu1 %v2377_v32 }
 0x415   : > { %2396 = vmatpush3.bf16.msra.mxu0 %v2393_v21  ;;  %v2379_v21 = vpack.c.bf16 %v1373_v28, %v1371_v0 }
 0x416   : > { %2398 = vmatprep.subr.bf16.mxu0 %v2397_v19  ;;  %1697 = vxpose.xlu1.b32.cont [9/16] (narrow) %v2492_v2, 16 }
 0x417   : > { %2380 = vmatpush1.bf16.msra.mxu1 %v2379_v21 }
 0x419   : > { %2400 = vmatpush3.bf16.msra.mxu0 %v2397_v19 }
 0x41a   : > { %2402 = vmatprep.subr.bf16.mxu0 %v2401_v18  ;;  %1698 = vxpose.xlu1.b32.cont [10/16] (narrow) %v2493_v27, 16 }
 0x41d   : > { %2404 = vmatpush3.bf16.msra.mxu0 %v2401_v18 }
 0x41e   : > { %2406 = vmatprep.subr.bf16.mxu0 %v2405_v5  ;;  %1699 = vxpose.xlu1.b32.cont [11/16] (narrow) %v2497_v26, 16 }
 0x421   : > { %2408 = vmatpush3.bf16.msra.mxu0 %v2405_v5 }
 0x422   : > { %2410 = vmatprep.subr.bf16.mxu0 %v2409_v48  ;;  %1700 = vxpose.xlu1.b32.cont [12/16] (narrow) %v2498_v42, 16 }
 0x425   : > { %2412 = vmatpush3.bf16.msra.mxu0 %v2409_v48 }
 0x426   : > { %1701 = vxpose.xlu1.b32.cont [13/16] (narrow) %v2502_v39, 16 }
 0x42a   : > { %1702 = vxpose.xlu1.b32.cont [14/16] (narrow) %v2503_v22, 16 }
 0x42e   : > { %1703 = vxpose.xlu1.b32.cont [15/16] (narrow) %v2507_v50, 16 }
 0x432   : > { %1704 = vxpose.xlu1.b32.end [16/16] (narrow) %v2508_v7, 16 }
 0x476   : > { %v1705_v1 = vpop.trf.xlu1 }
 0x477   : > { %2338 = vmatprep.mubr.f32.mxu0 %v1705_v1 }
 0x47a   : > { %v1706_v23 = vpop.trf.xlu1 }
 0x47b   : > { %2339 = vmatmul.mubr.f32.vlgmr.msra.gmra.mrb[18].mxu0 %v1706_v23 }
 0x4a4   : > { %v2284_v62 = vpop.f32.mrb[2].mxu0 }
 0x4a5   : > { %v1287_v2 = vadd.f32 %v2284_v62, %v3055_v33  ;;  %v1207_v19 = vpop.f32.mrb[3].mxu0 }
 0x4a6   : > { %v1286_v61 = vadd.f32 %v1207_v19, %v3058_v34 }
 0x4a7   : > { %v1303_v37 = vmax.f32 %v1287_v2, 0.0 }
 0x4a8   : > { %v1302_v51 = vmax.f32 %v1286_v61, 0.0 }
 0x4a9   : > { %v1319_v27 = vsel %vm641_vm1, %v1303_v37, 0.0 }
 0x4aa   : > { %v1318_v18 = vsel %vm641_vm1, %v1302_v51, 0.0 }
 0x4ab   : > { %v1320_v63 = vadd.f32 %v1319_v27, %v1318_v18  ;;  %v2287_v41 = vpop.f32.mrb[4].mxu0 }
 0x4ac   : > { %v1289_v29 = vadd.f32 %v2287_v41, %v3069_v38  ;;  %v1217_v26 = vpop.f32.mrb[5].mxu0 }
 0x4ad   : > { %v1288_v5 = vadd.f32 %v1217_v26, %v3061_v35 }
 0x4ae   : > { %v1305_v45 = vmax.f32 %v1289_v29, 0.0 }
 0x4af   : > { %v1304_v47 = vmax.f32 %v1288_v5, 0.0 }
 0x4b0   : > { %v2290_v42 = vpop.f32.mrb[6].mxu0  ;;  %v1323_v50 = vsel %vm641_vm1, %v1305_v45, 0.0 }
 0x4b1   : > { %v1321_v33 = vsel %vm641_vm1, %v1304_v47, 0.0  ;;  %v1291_v34 = vadd.f32 %v2290_v42, %v3093_v52  ;;  %v1227_v48 = vpop.f32.mrb[7].mxu0 }
 0x4b2   : > { %v1322_v39 = vadd.f32 %v1321_v33, %v1320_v63  ;;  %v1290_v22 = vadd.f32 %v1227_v48, %v3064_v36 }
 0x4b3   : > { %v1307_v7 = vmax.f32 %v1291_v34, 0.0 }
 0x4b4   : > { %v1306_v44 = vmax.f32 %v1290_v22, 0.0  ;;  %v1324_v3 = vadd.f32 %v1323_v50, %v1322_v39  ;;  %v2293_v38 = vpop.f32.mrb[8].mxu0 }
 0x4b5   : > { %v1293_v55 = vadd.f32 %v2293_v38, %v3099_v54  ;;  %v1237_v35 = vpop.f32.mrb[9].mxu0  ;;  %v1327_v52 = vsel %vm641_vm1, %v1307_v7, 0.0 }
 0x4b6   : > { %v1325_v49 = vsel %vm641_vm1, %v1306_v44, 0.0  ;;  %v1292_v11 = vadd.f32 %v1237_v35, %v3096_v53  ;;  %v3615_v44 = vpop.xlane.xlu0 %486 }
 0x4b7   : > { %v1326_v57 = vadd.f32 %v1325_v49, %v1324_v3  ;;  %v1309_v12 = vmax.f32 %v1293_v55, 0.0  ;;  %2655 = vrsqrt.f32 %v3615_v44 }
 0x4b8   : > { %v1308_v10 = vmax.f32 %v1292_v11, 0.0  ;;  %v2296_v13 = vpop.f32.mrb[10].mxu0 }
 0x4b9   : > { %v1328_v36 = vadd.f32 %v1327_v52, %v1326_v57  ;;  %v1295_v15 = vadd.f32 %v2296_v13, %v3108_v59  ;;  %v1247_v17 = vpop.f32.mrb[11].mxu0  ;;  %v1331_v30 = vsel %vm641_vm1, %v1309_v12, 0.0 }
 0x4ba   : > { %v1329_v25 = vsel %vm641_vm1, %v1308_v10, 0.0  ;;  %v1294_v14 = vadd.f32 %v1247_v17, %v3105_v58 }
 0x4bb   : > { %v1330_v54 = vadd.f32 %v1329_v25, %v1328_v36  ;;  %v1311_v6 = vmax.f32 %v1295_v15, 0.0 }
 0x4bc   : > { %v1310_v43 = vmax.f32 %v1294_v14, 0.0  ;;  %v2299_v53 = vpop.f32.mrb[12].mxu0 }
 0x4bd   : > { %v1332_v46 = vadd.f32 %v1331_v30, %v1330_v54  ;;  %v1297_v8 = vadd.f32 %v2299_v53, %v3140_v16  ;;  %v1257_v56 = vpop.f32.mrb[13].mxu0  ;;  %v1335_v0 = vsel %vm641_vm1, %v1311_v6, 0.0 }
 0x4be   : > { %v1333_v24 = vsel %vm641_vm1, %v1310_v43, 0.0  ;;  %v1296_v32 = vadd.f32 %v1257_v56, %v3124_v4 }
 0x4bf   : > { %v1334_v59 = vadd.f32 %v1333_v24, %v1332_v46  ;;  %v1313_v28 = vmax.f32 %v1297_v8, 0.0 }
 0x4c0   : > { %v1312_v21 = vmax.f32 %v1296_v32, 0.0  ;;  %v2302_v58 = vpop.f32.mrb[14].mxu0 }
 0x4c1   : > { %v1336_v1 = vadd.f32 %v1335_v0, %v1334_v59  ;;  %v1299_v23 = vadd.f32 %v2302_v58, %v3111_v60  ;;  %v1267_v62 = vpop.f32.mrb[15].mxu0  ;;  %v1339_v61 = vsel %vm641_vm1, %v1313_v28, 0.0 }
 0x4c2   : > { %v1337_v2 = vsel %vm641_vm1, %v1312_v21, 0.0  ;;  %v1298_v19 = vadd.f32 %v1267_v62, %v3074_v40 }
 0x4c3   : > { %v1338_v16 = vadd.f32 %v1337_v2, %v1336_v1  ;;  %v1315_v37 = vmax.f32 %v1299_v23, 0.0 }
 0x4c4   : > { %v1314_v51 = vmax.f32 %v1298_v19, 0.0  ;;  %v2305_v4 = vpop.f32.mrb[16].mxu0 }
 0x4c5   : > { %v1340_v27 = vadd.f32 %v1339_v61, %v1338_v16  ;;  %v1301_v18 = vadd.f32 %v2305_v4, %v3131_v9  ;;  %v1277_v63 = vpop.f32.mrb[17].mxu0  ;;  %v1343_v26 = vsel %vm641_vm1, %v1315_v37, 0.0 }
 0x4c6   : > { %v1341_v41 = vsel %vm641_vm1, %v1314_v51, 0.0  ;;  %v1300_v29 = vadd.f32 %v1277_v63, %v3153_v31 }
 0x4c7   : > { %v1342_v60 = vadd.f32 %v1341_v41, %v1340_v27  ;;  %v1317_v5 = vmax.f32 %v1301_v18, 0.0 }
 0x4c8   : > { %v1316_v40 = vmax.f32 %v1300_v29, 0.0 }
 0x4c9   : > { %v1344_v45 = vadd.f32 %v1343_v26, %v1342_v60  ;;  %v1347_v33 = vsel %vm641_vm1, %v1317_v5, 0.0 }
 0x4ca   : > { %v1345_v47 = vsel %vm641_vm1, %v1316_v40, 0.0 }
 0x4cb   : > { %v1346_v42 = vadd.f32 %v1345_v47, %v1344_v45 }
 0x4cd   : > { %v1348_v9 = vadd.f32 %v1347_v33, %v1346_v42 }
 0x4cf   : > { %v1349_v34 = vrot.slane %v1348_v9, 4 }
 0x4d1   : > { %v1350_v48 = vadd.f32 %v1349_v34, %v1348_v9 }
 0x4d3   : > { %v1351_v39 = vrot.slane %v1350_v48, 2 }
 0x4d5   : > { %v1352_v22 = vadd.f32 %v1351_v39, %v1350_v48 }
 0x4d7   : > { %v1353_v31 = vrot.slane %v1352_v22, 1 }
 0x4d9   : > { %v1354_v50 = vadd.f32 %v1353_v31, %v1352_v22 }
 0x4db   : > { %v1356_v7 = vmul.f32 0.0078125, %v1354_v50 }
 0x4dd   : > { %2145 = vmatmul.mubr.msk.f32.vlgmr.msra.gmra.mrb[16].mxu1 %vm641_vm1, %v1356_v7  ;;  %1358 = vst.msk [vmem:[%s433_s26] sm:$0x1] %vm1357_vm8, %v1356_v7  ;;  %s2663_s26 = scalar_lea.vmem %s2662_s19, 32 }
 0x4de   : > { %p2665_p1 = scmp.lt.s32.totalorder %s2663_s26, %s2657_s3 }
 0x4e0   : > { %p2666_p2 = por %p2665_p1, %p2664_p0 }
 0x4e2   : > { %p2667_p3 = pnand %p2666_p2, %p2660_p13 }
 0x4e4   : > { %2670 = shalt.err (!%p2667_p3)
}
 0x4e5   : > { %s2671_s15 = scalar_lea.hbm %s3623_s30, 16  ;;  %s2675_s1 = scalar_lea.hbm %s3747_s10, 32 }
 0x4e6   : > { %p2672_p4 = scmp.ne.s32.totalorder %s3623_s30, %s2671_s15  ;;  %p2676_p9 = scmp.lt.u32.totalorder %s3623_s30, %s3747_s10 }
 0x4e7   : > { %p2677_p10 = scmp.lt.u32.totalorder %s2675_s1, %s2671_s15  ;;  %p2679_p12 = scmp.lt.u32.totalorder %s2671_s15, %s3623_s30 }
 0x4e8   : > { %p2673_p7 = pnand %p2672_p4, %p2896_p5 }
 0x4e9   : > { %p2678_p11 = por %p2677_p10, %p2676_p9 }
 0x4ea   : > { %p2674_p8 = pneg %p2673_p7 }
 0x4eb   : > { %p2680_p13 = por %p2679_p12, %p2678_p11 }
 0x4ed   : > { %p2681_p0 = pnand %p2680_p13, %p2674_p8 }
 0x4ef   : > { %2684 = shalt.err (!%p2681_p0)
}
 0x4f0   : > { %2414 = dma.vmem_to_hbm [thread:$0]  (%p2896_p5), %s3625_s20, 16, %s3623_s30, %s3632_s2  }
 0x4f1   : > { %s3768_s3 = scalar_lea.vmem [#allocation2], %s3020_s28  ;;  %s1870_s16 = scalar_lea.sflag [#allocation3], %s3020_s28 }
 0x4f2   : > { %s1901_s26 = sshll.u32 %s3768_s3, 4  ;;  %s2788_s15 = smov [#allocation2]   ;;  %s1902_s26 = int_to_ptr.vmem [resolvable:$true] %s1901_s26 }
 0x4f3   : > { %s2685_s29 = scalar_lea.vmem %s1902_s26, 16  ;;  %s2689_s1 = sshll.u32 %s2788_s15, 4  ;;  %s2690_s1 = int_to_ptr.vmem [resolvable:$false] %s2689_s1 }
 0x4f4   : > { %p2686_p1 = scmp.ne.s32.totalorder %s1902_s26, %s2685_s29  ;;  %s2691_s18 = scalar_lea.vmem %s2690_s1, 32 }
 0x4f5   : > { %p2692_p4 = scmp.lt.s32.totalorder %s1902_s26, %s2690_s1  ;;  %p2693_p7 = scmp.lt.s32.totalorder %s2691_s18, %s2685_s29 }
 0x4f6   : > { %p2687_p2 = pnand %p2686_p1, %p2896_p5 }
 0x4f7   : > { %p2694_p8 = por %p2693_p7, %p2692_p4 }
 0x4f8   : > { %p2688_p3 = pneg %p2687_p2 }
 0x4fa   : > { %p2695_p9 = pnand %p2694_p8, %p2688_p3 }
 0x4fc   : > { %2698 = shalt.err (!%p2695_p9)
}
 0x4fd   : > { %s2699_s30 = scalar_lea.hbm %s3630_s0, 16  ;;  %s2703_s3 = scalar_lea.hbm %s3745_s8, 32 }
 0x4fe   : > { %p2700_p10 = scmp.ne.s32.totalorder %s3630_s0, %s2699_s30  ;;  %p2704_p13 = scmp.lt.u32.totalorder %s3630_s0, %s3745_s8 }
 0x4ff   : > { %p2705_p0 = scmp.lt.u32.totalorder %s2703_s3, %s2699_s30  ;;  %p2707_p2 = scmp.lt.u32.totalorder %s2699_s30, %s3630_s0 }
 0x500   : > { %p2701_p11 = pnand %p2700_p10, %p2896_p5 }
 0x501   : > { %p2706_p1 = por %p2705_p0, %p2704_p13 }
 0x502   : > { %p2702_p12 = pneg %p2701_p11 }
 0x503   : > { %p2708_p3 = por %p2707_p2, %p2706_p1 }
 0x505   : > { %p2709_p4 = pnand %p2708_p3, %p2702_p12 }
 0x507   : > { %2712 = shalt.err (!%p2709_p4)
}
 0x508   : > { %2413 = dma.vmem_to_hbm [thread:$0]  (%p2896_p5), %s1902_s26, 16, %s3630_s0, %s1870_s16   ;;  %v2656_v3 = vpop.eup %2655  ;;  %vm490_vm9 = vcmp.eq.f32.partialorder %v3615_v44, inf  ;;  %v493_v35 = vand.u32 2147483648, %v3615_v44  ;;  %vm492_vm10 = vcmp.eq.f32.partialorder %v3615_v44, 0.0  ;;  %vm1866_vm11 = vcmask 23552   ;;  %v3769_v36 = vld [vmem:[#allocation10_spill] sm:$0xff] }
 0x509   : > { %v489_v38 = vmul.f32 %v2656_v3, %v3615_v44  ;;  %s2155_s29 = sshll.u32 %s2911_s17, 4  ;;  %v1375_v13 = vld [vmem:[%s3744_s7] sm:$0x3]  ;;  %v1383_v15 = vsub.s32 1, %v3769_v36  ;;  %v2789_v17 = vmov 1966171168   ;;  %v3770_v32 = vlaneseq }
 0x50a   : > { %s465_s0 = scalar_lea.vmem %s3749_s12, %s2155_s29  ;;  %v1465_v25 = vunpack.c.l.s4 %v2789_v17  ;;  %v1380_v14 = vrot.slane %v1375_v13, %v3036_v20  ;;  %s2109_s17 = sshll.u32 %s3020_s28, 1 }
 0x50b   : > { %v491_v55 = vsel %vm490_vm9, %v3615_v44, %v489_v38  ;;  %v1384_v54 = vrot.slane %v1375_v13, %v1383_v15  ;;  %s2156_s20 = sshll.u32 %s2877_s25, 5  ;;  %s440_s19 = scalar_lea.vmem [#allocation6], %s2109_s17  ;;  %vm1481_vm12 = vcmp.lt.s32.totalorder %v3770_v32, 256 }
 0x50c   : > { %v494_v49 = vsel %vm492_vm10, %v493_v35, %v491_v55  ;;  %v1466_v30 = vunpack.c.0.s8 %v1465_v25  ;;  %s1931_s3 = sshll.u32 %s440_s19, 4  ;;  %s3698_s29 = scalar_lea.hbm %s3748_s11, %s2156_s20  ;;  %s1932_s3 = int_to_ptr.vmem [resolvable:$true] %s1931_s3 }
 0x50d   : > { %v1863_v11 = vrot.slane %v494_v49, %v3036_v20  ;;  %s2713_s28 = scalar_lea.vmem %s1932_s3, 32  ;;  %s2790_s18 = smov [#allocation6]  }
 0x50e   : > { %v1469_v8 = vsub.s32 %v1466_v30, %v3769_v36  ;;  %p2714_p7 = scmp.ne.s32.totalorder %s1932_s3, %s2713_s28  ;;  %s2717_s25 = sshll.u32 %s2790_s18, 4  ;;  %s2718_s25 = int_to_ptr.vmem [resolvable:$false] %s2717_s25 }
 0x50f   : > { %s2719_s30 = scalar_lea.vmem %s2718_s25, 64  ;;  %p2720_p10 = scmp.lt.s32.totalorder %s1932_s3, %s2718_s25 }
 0x510   : > { %p2715_p8 = pnand %p2714_p7, %p2896_p5  ;;  %p2721_p11 = scmp.lt.s32.totalorder %s2719_s30, %s2713_s28 }
 0x512   : > { %p2716_p9 = pneg %p2715_p8  ;;  %p2722_p12 = por %p2721_p11, %p2720_p10 }
 0x514   : > { %p2723_p13 = pnand %p2722_p12, %p2716_p9 }
 0x54e   : > { %v2340_v57 = vpop.f32.mrb[18].mxu0 }
 0x54f   : > { %v1865_v52 = vmul.f32 %v2340_v57, %v1863_v11  ;;  %v1851_v12 = vpop.f32.mrb[19].mxu0 }
 0x550   : > { %v1864_v10 = vmul.f32 %v1863_v11, %v1851_v12 }
 0x551   : > { %1868 = vst.msk [vmem:[%s465_s0 + $0x8] sm:$0xff] %vm1866_vm11, %v1865_v52 }
 0x552   : > { %1867 = vst.msk [vmem:[%s465_s0] sm:$0xff] %vm1866_vm11, %v1864_v10 }
 0x5b0   : > { %v1456_v6 = vpop.f32.mrb[16].mxu1 }
 0x5b1   : > { %v1457_v43 = vadd.f32 %v1456_v6, %v1380_v14  ;;  %v1458_v53 = vpop.f32.mrb[17].mxu1 }
 0x5b2   : > { %v1459_v46 = vadd.f32 %v1458_v53, %v1384_v54 }
 0x5b4   : > { %v1463_v56 = vcombine.low %v1457_v43, %v1459_v46 }
 0x5b6   : > { %v1470_v24 = vrot.slane %v1463_v56, %v1469_v8 }
 0x5b8   : > { %v1477_v59 = vrot.slane %v1470_v24, %v1469_v8 }
 0x5ba   : > { %1483 = vst.msk [vmem:[%s440_s19] sm:$0x3] %vm1481_vm12, %v1477_v59 }
 0x5bb   : > { %2726 = shalt.err (!%p2723_p13)
}
 0x5bc   : > { %s2727_s0 = scalar_lea.hbm %s3698_s29, 32  ;;  %s2731_s17 = scalar_lea.hbm %s3748_s11, 64 }
 0x5bd   : > { %p2728_p0 = scmp.ne.s32.totalorder %s3698_s29, %s2727_s0  ;;  %p2732_p3 = scmp.lt.u32.totalorder %s3698_s29, %s3748_s11 }
 0x5be   : > { %p2733_p4 = scmp.lt.u32.totalorder %s2731_s17, %s2727_s0  ;;  %p2735_p8 = scmp.lt.u32.totalorder %s2727_s0, %s3698_s29 }
 0x5bf   : > { %p2729_p1 = pnand %p2728_p0, %p2896_p5 }
 0x5c0   : > { %p2734_p7 = por %p2733_p4, %p2732_p3 }
 0x5c1   : > { %p2730_p2 = pneg %p2729_p1 }
 0x5c2   : > { %p2736_p9 = por %p2735_p8, %p2734_p7 }
 0x5c4   : > { %p2737_p10 = pnand %p2736_p9, %p2730_p2 }
 0x5c6   : > { %2740 = shalt.err (!%p2737_p10)
}
 0x5c7   : > { %2415 = dma.vmem_to_hbm [thread:$0]  (%p2896_p5), %s1932_s3, 32, %s3698_s29, %s3632_s2  }
 0x5c8 PF: > { %p2429_p11 = scmp.ge.s32.totalorder %s2779_s24, 2  ;;  %s1946_s15 = sand.u32 1, %s2767_s21  }
 0x5c9   : > { %s1947_s1 = scalar_lea.sflag [#allocation3], %s1946_s15 }
 0x5ca   : > { %p2420_p12 = pnand %p2429_p11, %p2900_p6 }
 0x5cc   : > { %2758 = dma.done.wait (!%p2420_p12), %s1947_s1, 16  }
 0x5cd   : > { %2760 = vsyncadd (!%p2420_p12), %s1947_s1, 4294967280  ;;  %s3771_s28 = sadd.s32 4294967294, %s2779_s24  }
 0x5ce   : > { %s1962_s18 = sand.u32 1, %s3771_s28  }
 0x5cf   : > { %s1963_s25 = scalar_lea.sflag [#allocation5], %s1962_s18 }
 0x5d0   : > { %2762 = dma.done.wait (!%p2420_p12), %s1963_s25, 48  }
 0x5d1   : > { %2764 = vsyncadd (!%p2420_p12), %s1963_s25, 4294967248  ;;  %s3772_s13 = sld [smem:[#allocation9_spill]]  ;;  %p26_p5 = scmp.ge.s32.totalorder %s2881_s27, 4  }
 0x5d2   : > { %s3773_s21 = smov %s2771_s22  ;;  %s3774_s22 = smov %s2775_s23 }
 0x5d3   : > { %s3776_s24 = smov %s2881_s27  ;;  %28 = sbr.rel (!%p26_p5) target bundleno = 10 (0xa), region = 146 }
 0x5d7   : > { %s3775_s23 = smov %s3772_s13 }
 0x5da   :  { %1984 = vsyncpa [#allocation3], 1 }
 0x5db   :  { %1986 = vsyncpa [#allocation3 + $0x1], 1 }
 0x5dc   :  { %1987 = vsyncpa [#allocation5], 1 }
 0x5dd   :  { %1989 = vsyncpa [#allocation5 + $0x1], 1 }

</bundles_post_ra>
